<compile_context>
chip_gen: v7x
topology: tpu7x:2x2x1
jax: 0.10.0
libtpu: 0.0.40
codegen_flags: <defaults>
</compile_context>

<pallas_src>
import functools

import jax
import jax.numpy as jnp
from jax.experimental import pallas as pl
from jax.experimental.pallas import tpu as pltpu


def _sigmoid(x):
    # exp() runs on the EUP (otherwise idle here).  The divide could also move
    # to the EUP via pl.reciprocal(1 + e, approx=True); it is kept exact so the
    # kernel stays numerically interchangeable with the XLA reference -- the
    # sigmoid only touches ~(C + HW) values per grid step, far from the
    # critical slot.
    return 1.0 / (1.0 + jnp.exp(-x))


def _cbam_kernel(x_ref, w1_ref, b1_ref, w2_ref, b2_ref, wm_ref, misc_ref,
                 out_ref, *, TB, C, H, W, ksize):
    HW = H * W
    pad = (ksize - 1) // 2

    x = x_ref[...].astype(jnp.float32)                      # (TB, C, HW) lane-dense

    # ---------------- ChannelGate (MLP on the MXU) ----------------
    # Global avg / max pool over the flattened spatial axis: lane reductions.
    avg = jnp.sum(x, axis=2, keepdims=True) * (1.0 / HW)    # (TB, C, 1)
    mxp = jnp.max(x, axis=2, keepdims=True)                 # (TB, C, 1)
    # Column-major pooled matrix (C on sublanes, pooled samples on lanes):
    # columns [0, TB) = avg per batch, [TB, 2TB) = max per batch.
    pooled = jnp.concatenate([avg[i] for i in range(TB)]
                             + [mxp[i] for i in range(TB)], axis=1)   # (C, 2*TB)
    # PyTorch Linear layouts: w1 (hidden, C), w2 (C, hidden).
    h = jnp.dot(w1_ref[...], pooled,
                preferred_element_type=jnp.float32) + b1_ref[...]    # (hidden, 2*TB)
    h = jnp.maximum(h, 0.0)
    att = jnp.dot(w2_ref[...], h,
                  preferred_element_type=jnp.float32) + b2_ref[...]  # (C, 2*TB)
    att = att[:, :TB] + att[:, TB:]                         # (C, TB): avg + max branches
    scale_c = _sigmoid(att)                                 # (C, TB), sublane-major in C
    scale_c = jnp.stack([scale_c[:, i:i + 1] for i in range(TB)], axis=0)  # (TB, C, 1)
    x_cg = x * scale_c                                      # (TB, C, HW)

    # ---------------- SpatialGate ----------------
    # ChannelPool: max / mean over C (sublane reductions), stacked 2D so every
    # dx lane-roll is shared by both pooled channels and all TB batches.
    cmax = jnp.max(x_cg, axis=1, keepdims=True)             # (TB, 1, HW)
    cmean = jnp.sum(x_cg, axis=1, keepdims=True) * (1.0 / C)
    cm = jnp.concatenate([cmax[i] for i in range(TB)]
                         + [cmean[i] for i in range(TB)], axis=0)     # (2*TB, HW)

    # 7x7 conv (2 -> 1 ch, zero padding) in the flattened domain with only 12
    # lane-rolls: 6 dx shifts of the pooled map + 6 dy shifts of the per-row
    # partial sums (the dy shift of the weights is pre-rolled into wm on host).
    shifted = []
    for dxi in range(ksize):
        off = dxi - pad
        s = cm if off == 0 else pltpu.roll(cm, shift=(-off) % HW, axis=1)
        shifted.append((s[:TB], s[TB:]))                    # (max, mean) halves, (TB, HW)

    conv = None
    for dyi in range(ksize):
        wdy = wm_ref[dyi]                                   # (2*ksize, HW) dense slab
        part = None
        for dxi in range(ksize):
            smax, smean = shifted[dxi]
            term = (wdy[2 * dxi:2 * dxi + 1] * smax
                    + wdy[2 * dxi + 1:2 * dxi + 2] * smean)           # (TB, HW) FMAs
            part = term if part is None else part + term
        dyo = dyi - pad
        if dyo != 0:
            part = pltpu.roll(part, shift=(-dyo * W) % HW, axis=1)
        conv = part if conv is None else conv + part
    conv = conv + misc_ref[0]                               # + BN shift (SMEM scalar)

    scale_s = _sigmoid(conv)                                # (TB, HW)
    for i in range(TB):                                     # lane-dense stores
        out_ref[i] = (x_cg[i] * scale_s[i:i + 1, :]).astype(out_ref.dtype)


def _build_conv_table(conv_w, bn_scale, H, W):
    """Host precompute: (k, 2k, HW) dense table of weight * pad-mask * bn_scale.

    Row [dy, 2*dx + c] holds, per pooled channel c (0=max, 1=mean), the value
    conv_w[0, c, dy, dx] * bn_scale at every output position whose tap reads
    inside the zero-padded HxW map (0 where it would read padding; this also
    neutralizes roll wrap-around).  Each dy slab is additionally pre-rolled by
    (dy - pad) * W along HW, so the kernel applies a single shared lane-roll
    per dy row instead of one per tap.
    """
    k = conv_w.shape[-1]
    p = (k - 1) // 2
    HW = H * W
    d = jnp.arange(k)[:, None]
    yy = jnp.arange(H)[None, :]
    xx = jnp.arange(W)[None, :]
    my = ((yy + d - p) >= 0) & ((yy + d - p) < H)           # (k, H)
    mx = ((xx + d - p) >= 0) & ((xx + d - p) < W)           # (k, W)
    mask = (my[:, None, :, None] & mx[None, :, None, :]).astype(jnp.float32)  # (k,k,H,W)
    w = conv_w[0].astype(jnp.float32) * jnp.asarray(bn_scale, jnp.float32)    # (2,k,k)
    wm = w[:, :, :, None, None] * mask[None]                # (2, k, k, H, W)
    wm = jnp.transpose(wm, (1, 2, 0, 3, 4)).reshape(k, k, 2, HW)  # (dy, dx, c, HW)
    wm = jnp.stack([jnp.roll(wm[dy], (dy - p) * W, axis=-1) for dy in range(k)],
                   axis=0)                                  # pre-roll the dy component
    return wm.reshape(k, 2 * k, HW)                         # dense 14-row slabs per dy


def _pick_batch_tile(B, bytes_per_batch):
    """Batch elements per grid step: big enough to amortise per-step overhead,
    but keep >= 2 'parallel' grid steps (when B >= 2) so both v7x TCs get work."""
    target = 2 << 20                                        # ~2 MiB of activations/step
    tb = max(1, min(B, target // max(1, bytes_per_batch)))
    if B >= 2:
        tb = max(1, min(tb, B // 2))
    while B % tb:                                           # block must tile B exactly
        tb -= 1
    return tb


def cbam_forward(x, w1, b1, w2, b2, conv_w, bn_scale, bn_shift):
    B, C, H, W = x.shape
    HW = H * W
    hidden = w1.shape[0]                                    # PyTorch layout: w1 (hidden, C)
    ksize = conv_w.shape[-1]

    # Lane-dense layout requirements of this kernel (see review notes).
    assert C % 8 == 0, f"CBAM Pallas kernel requires C % 8 == 0, got C={C}"
    assert HW % 128 == 0, f"CBAM Pallas kernel requires H*W % 128 == 0, got {HW}"
    assert hidden >= 1, "gate_channels // reduction_ratio must be >= 1"

    TB = _pick_batch_tile(B, C * HW * x.dtype.itemsize)
    grid = (B // TB,)
    # TODO(synk): when B == 1 a single grid step leaves one v7x TC idle; a
    # C-split path would need a cross-block reduction for the channel pool.

    wm = _build_conv_table(conv_w, bn_scale, H, W)          # (k, 2k, HW) VMEM table
    misc = jnp.asarray([bn_shift], dtype=jnp.float32)       # (1,) SMEM

    kernel = functools.partial(_cbam_kernel, TB=TB, C=C, H=H, W=W, ksize=ksize)

    out = pl.pallas_call(
        kernel,
        out_shape=jax.ShapeDtypeStruct((B, C, HW), x.dtype),
        grid=grid,
        in_specs=[
            pl.BlockSpec((TB, C, HW), lambda b: (b, 0, 0)),          # x (lane-dense)
            pl.BlockSpec((hidden, C), lambda b: (0, 0)),             # W1 (hidden, C)
            pl.BlockSpec((hidden, 1), lambda b: (0, 0)),             # b1 column
            pl.BlockSpec((C, hidden), lambda b: (0, 0)),             # W2 (C, hidden)
            pl.BlockSpec((C, 1), lambda b: (0, 0)),                  # b2 column
            pl.BlockSpec((ksize, 2 * ksize, HW), lambda b: (0, 0, 0)),  # conv tap table
            pl.BlockSpec(memory_space=pltpu.MemorySpace.SMEM),       # [bn_shift]
        ],
        out_specs=pl.BlockSpec((TB, C, HW), lambda b: (b, 0, 0)),
        compiler_params=pltpu.CompilerParams(
            dimension_semantics=("parallel",)),   # batch-tile axis: megacore sharding
    )(x.reshape(B, C, HW), w1, b1.reshape(hidden, 1), w2,
      b2.reshape(C, 1), wm, misc)
    return out.reshape(B, C, H, W)


# ----------------- pure-JAX reference (for correctness check) -----------------
def cbam_reference(x, w1, b1, w2, b2, conv_w, bn_scale, bn_shift):
    B, C, H, W = x.shape
    avg = x.mean(axis=(2, 3))                     # (B, C)
    mxp = x.max(axis=(2, 3))                      # (B, C)

    def mlp(p):                                   # PyTorch Linear layouts
        h = jnp.maximum(p @ w1.T + b1, 0.0)       # (B, hidden)
        return h @ w2.T + b2                      # (B, C)

    att = mlp(avg) + mlp(mxp)
    x_cg = x * jax.nn.sigmoid(att)[:, :, None, None]

    comp = jnp.stack([x_cg.max(axis=1), x_cg.mean(axis=1)], axis=1)   # (B, 2, H, W)
    pad = (conv_w.shape[-1] - 1) // 2
    conv = jax.lax.conv_general_dilated(
        comp, conv_w, window_strides=(1, 1), padding=((pad, pad), (pad, pad)),
        dimension_numbers=("NCHW", "OIHW", "NCHW"))
    bn = conv * bn_scale + bn_shift
    return x_cg * jax.nn.sigmoid(bn)


def init_params(key, C, reduction_ratio=16, ksize=7):
    hidden = max(C // reduction_ratio, 1)
    k1, k2, k3 = jax.random.split(key, 3)
    # c2_msra_fill: kaiming-normal weights, zero biases (PyTorch layouts).
    w1 = jax.random.normal(k1, (hidden, C), jnp.float32) * (2.0 / C) ** 0.5
    b1 = jnp.zeros((hidden,), jnp.float32)
    w2 = jax.random.normal(k2, (C, hidden), jnp.float32) * (2.0 / hidden) ** 0.5
    b2 = jnp.zeros((C,), jnp.float32)
    conv_w = (jax.random.normal(k3, (1, 2, ksize, ksize), jnp.float32)
              * (2.0 / (2 * ksize * ksize)) ** 0.5)
    # BatchNorm2d(1) eval-mode, default running stats and affine params.
    eps = 1e-5
    gamma, beta, rmean, rvar = 1.0, 0.0, 0.0, 1.0
    bn_scale = gamma / (rvar + eps) ** 0.5
    bn_shift = beta - rmean * bn_scale
    return w1, b1, w2, b2, conv_w, bn_scale, bn_shift


if __name__ == "__main__":
    B, C, H, W = 2, 32, 16, 16       # gate_channels=32, reduction_ratio=16 -> hidden=2
    key = jax.random.PRNGKey(0)
    kx, kp = jax.random.split(key)
    x = jax.random.normal(kx, (B, C, H, W), jnp.float32)
    params = init_params(kp, C)

    out = jax.block_until_ready(cbam_forward(x, *params))

    ref = cbam_reference(x, *params)
    err = float(jnp.max(jnp.abs(out - ref)))
    assert err < 1e-3, f"Pallas/XLA mismatch: max abs err = {err}"

    print("KERNEL_OK")
</pallas_src>

<mosaic_0001>
module attributes {stable_mosaic.version = 11 : i64} {
  func.func @_cbam_kernel(%arg0: i32, %arg1: memref<1x32x256xf32, #tpu.memory_space<vmem>>, %arg2: memref<2x32xf32, #tpu.memory_space<vmem>>, %arg3: memref<2x1xf32, #tpu.memory_space<vmem>>, %arg4: memref<32x2xf32, #tpu.memory_space<vmem>>, %arg5: memref<32x1xf32, #tpu.memory_space<vmem>>, %arg6: memref<7x14x256xf32, #tpu.memory_space<vmem>>, %arg7: memref<1xf32, #tpu.memory_space<smem>>, %arg8: memref<1x32x256xf32, #tpu.memory_space<vmem>>) attributes {dimension_semantics = [#tpu.dimension_semantics<parallel>], iteration_bounds = array<i64: 2>, scalar_prefetch = 0 : i64, scratch_operands = 0 : i64, tpu.core_type = #tpu.core_type<tc>, window_params = [{transform_indices = @transform_0, window_bounds = array<i64: 1, 32, 256>}, {pipeline_mode = #tpu.pipeline_mode<synchronous>, transform_indices = @transform_1, window_bounds = array<i64: 2, 32>}, {pipeline_mode = #tpu.pipeline_mode<synchronous>, transform_indices = @transform_2, window_bounds = array<i64: 2, 1>}, {pipeline_mode = #tpu.pipeline_mode<synchronous>, transform_indices = @transform_3, window_bounds = array<i64: 32, 2>}, {pipeline_mode = #tpu.pipeline_mode<synchronous>, transform_indices = @transform_4, window_bounds = array<i64: 32, 1>}, {pipeline_mode = #tpu.pipeline_mode<synchronous>, transform_indices = @transform_5, window_bounds = array<i64: 7, 14, 256>}, {transform_indices = @transform_6, window_bounds = array<i64: 1>}, {transform_indices = @transform_7, window_bounds = array<i64: 1, 32, 256>}]} {
    %c0 = arith.constant 0 : index
    %c0_0 = arith.constant 0 : index
    %c0_1 = arith.constant 0 : index
    %0 = vector.load %arg1[%c0, %c0_0, %c0_1] : memref<1x32x256xf32, #tpu.memory_space<vmem>>, vector<1x32x256xf32>
    %cst = arith.constant dense<0.000000e+00> : vector<1x32xf32>
    %1 = vector.multi_reduction <add>, %0, %cst [2] : vector<1x32x256xf32> to vector<1x32xf32>
    %2 = vector.shape_cast %1 : vector<1x32xf32> to vector<1x32x1xf32>
    %cst_2 = arith.constant 3.906250e-03 : f32
    %3 = vector.broadcast %cst_2 : f32 to vector<1x32x1xf32>
    %4 = arith.mulf %2, %3 : vector<1x32x1xf32>
    %cst_3 = arith.constant dense<0xFF800000> : vector<1x32xf32>
    %5 = vector.multi_reduction <maximumf>, %0, %cst_3 [2] : vector<1x32x256xf32> to vector<1x32xf32>
    %6 = vector.shape_cast %5 : vector<1x32xf32> to vector<1x32x1xf32>
    %7 = vector.shape_cast %4 : vector<1x32x1xf32> to vector<32x1xf32>
    %8 = vector.shape_cast %6 : vector<1x32x1xf32> to vector<32x1xf32>
    %9 = tpu.concatenate %7, %8 in 1 : vector<32x1xf32>, vector<32x1xf32> -> vector<32x2xf32>
    %c0_4 = arith.constant 0 : index
    %c0_5 = arith.constant 0 : index
    %10 = vector.load %arg2[%c0_4, %c0_5] : memref<2x32xf32, #tpu.memory_space<vmem>>, vector<2x32xf32>
    %cst_6 = arith.constant dense<0.000000e+00> : vector<2x2xf32>
    %11 = tpu.matmul %10, %9, %cst_6 {dimension_numbers = #tpu.dot_dimension_numbers<[1], [0], [0], [1], [0, 0, 1, 1], [], []>} : vector<2x32xf32>, vector<32x2xf32>, vector<2x2xf32> -> vector<2x2xf32>
    %c0_7 = arith.constant 0 : index
    %c0_8 = arith.constant 0 : index
    %12 = vector.load %arg3[%c0_7, %c0_8] : memref<2x1xf32, #tpu.memory_space<vmem>>, vector<2x1xf32>
    %13 = vector.broadcast %12 : vector<2x1xf32> to vector<2x2xf32>
    %14 = arith.addf %11, %13 : vector<2x2xf32>
    %cst_9 = arith.constant 0.000000e+00 : f32
    %15 = vector.broadcast %cst_9 : f32 to vector<2x2xf32>
    %16 = arith.maximumf %14, %15 : vector<2x2xf32>
    %c0_10 = arith.constant 0 : index
    %c0_11 = arith.constant 0 : index
    %17 = vector.load %arg4[%c0_10, %c0_11] : memref<32x2xf32, #tpu.memory_space<vmem>>, vector<32x2xf32>
    %cst_12 = arith.constant dense<0.000000e+00> : vector<32x2xf32>
    %18 = tpu.matmul %17, %16, %cst_12 {dimension_numbers = #tpu.dot_dimension_numbers<[1], [0], [0], [1], [0, 0, 1, 1], [], []>} : vector<32x2xf32>, vector<2x2xf32>, vector<32x2xf32> -> vector<32x2xf32>
    %c0_13 = arith.constant 0 : index
    %c0_14 = arith.constant 0 : index
    %19 = vector.load %arg5[%c0_13, %c0_14] : memref<32x1xf32, #tpu.memory_space<vmem>>, vector<32x1xf32>
    %20 = vector.broadcast %19 : vector<32x1xf32> to vector<32x2xf32>
    %21 = arith.addf %18, %20 : vector<32x2xf32>
    %22 = vector.extract_strided_slice %21 {offsets = [0, 0], sizes = [32, 1], strides = [1, 1]} : vector<32x2xf32> to vector<32x1xf32>
    %23 = vector.extract_strided_slice %21 {offsets = [0, 1], sizes = [32, 1], strides = [1, 1]} : vector<32x2xf32> to vector<32x1xf32>
    %24 = arith.addf %22, %23 : vector<32x1xf32>
    %cst_15 = arith.constant 0.000000e+00 : f32
    %25 = vector.broadcast %cst_15 : f32 to vector<32x1xf32>
    %26 = arith.subf %25, %24 : vector<32x1xf32>
    %27 = math.exp %26 : vector<32x1xf32>
    %cst_16 = arith.constant 1.000000e+00 : f32
    %28 = vector.broadcast %cst_16 : f32 to vector<32x1xf32>
    %29 = arith.addf %28, %27 : vector<32x1xf32>
    %cst_17 = arith.constant 1.000000e+00 : f32
    %30 = vector.broadcast %cst_17 : f32 to vector<32x1xf32>
    %31 = arith.divf %30, %29 : vector<32x1xf32>
    %32 = vector.shape_cast %31 : vector<32x1xf32> to vector<1x32x1xf32>
    %33 = vector.broadcast %32 : vector<1x32x1xf32> to vector<1x32x256xf32>
    %34 = arith.mulf %0, %33 : vector<1x32x256xf32>
    %cst_18 = arith.constant dense<0xFF800000> : vector<1x256xf32>
    %35 = vector.multi_reduction <maximumf>, %34, %cst_18 [1] : vector<1x32x256xf32> to vector<1x256xf32>
    %36 = vector.shape_cast %35 : vector<1x256xf32> to vector<1x1x256xf32>
    %cst_19 = arith.constant dense<0.000000e+00> : vector<1x256xf32>
    %37 = vector.multi_reduction <add>, %34, %cst_19 [1] : vector<1x32x256xf32> to vector<1x256xf32>
    %38 = vector.shape_cast %37 : vector<1x256xf32> to vector<1x1x256xf32>
    %cst_20 = arith.constant 3.125000e-02 : f32
    %39 = vector.broadcast %cst_20 : f32 to vector<1x1x256xf32>
    %40 = arith.mulf %38, %39 : vector<1x1x256xf32>
    %41 = vector.shape_cast %36 : vector<1x1x256xf32> to vector<1x256xf32>
    %42 = vector.shape_cast %40 : vector<1x1x256xf32> to vector<1x256xf32>
    %43 = tpu.concatenate %41, %42 in 0 : vector<1x256xf32>, vector<1x256xf32> -> vector<2x256xf32>
    %c3_i32 = arith.constant 3 : i32
    %44 = tpu.dynamic_rotate %43 by %c3_i32 dim 1 : vector<2x256xf32>, i32 -> vector<2x256xf32>
    %45 = vector.extract_strided_slice %44 {offsets = [0, 0], sizes = [1, 256], strides = [1, 1]} : vector<2x256xf32> to vector<1x256xf32>
    %46 = vector.extract_strided_slice %44 {offsets = [1, 0], sizes = [1, 256], strides = [1, 1]} : vector<2x256xf32> to vector<1x256xf32>
    %c2_i32 = arith.constant 2 : i32
    %47 = tpu.dynamic_rotate %43 by %c2_i32 dim 1 : vector<2x256xf32>, i32 -> vector<2x256xf32>
    %48 = vector.extract_strided_slice %47 {offsets = [0, 0], sizes = [1, 256], strides = [1, 1]} : vector<2x256xf32> to vector<1x256xf32>
    %49 = vector.extract_strided_slice %47 {offsets = [1, 0], sizes = [1, 256], strides = [1, 1]} : vector<2x256xf32> to vector<1x256xf32>
    %c1_i32 = arith.constant 1 : i32
    %50 = tpu.dynamic_rotate %43 by %c1_i32 dim 1 : vector<2x256xf32>, i32 -> vector<2x256xf32>
    %51 = vector.extract_strided_slice %50 {offsets = [0, 0], sizes = [1, 256], strides = [1, 1]} : vector<2x256xf32> to vector<1x256xf32>
    %52 = vector.extract_strided_slice %50 {offsets = [1, 0], sizes = [1, 256], strides = [1, 1]} : vector<2x256xf32> to vector<1x256xf32>
    %53 = vector.extract_strided_slice %43 {offsets = [0, 0], sizes = [1, 256], strides = [1, 1]} : vector<2x256xf32> to vector<1x256xf32>
    %54 = vector.extract_strided_slice %43 {offsets = [1, 0], sizes = [1, 256], strides = [1, 1]} : vector<2x256xf32> to vector<1x256xf32>
    %c255_i32 = arith.constant 255 : i32
    %55 = tpu.dynamic_rotate %43 by %c255_i32 dim 1 : vector<2x256xf32>, i32 -> vector<2x256xf32>
    %56 = vector.extract_strided_slice %55 {offsets = [0, 0], sizes = [1, 256], strides = [1, 1]} : vector<2x256xf32> to vector<1x256xf32>
    %57 = vector.extract_strided_slice %55 {offsets = [1, 0], sizes = [1, 256], strides = [1, 1]} : vector<2x256xf32> to vector<1x256xf32>
    %c254_i32 = arith.constant 254 : i32
    %58 = tpu.dynamic_rotate %43 by %c254_i32 dim 1 : vector<2x256xf32>, i32 -> vector<2x256xf32>
    %59 = vector.extract_strided_slice %58 {offsets = [0, 0], sizes = [1, 256], strides = [1, 1]} : vector<2x256xf32> to vector<1x256xf32>
    %60 = vector.extract_strided_slice %58 {offsets = [1, 0], sizes = [1, 256], strides = [1, 1]} : vector<2x256xf32> to vector<1x256xf32>
    %c253_i32 = arith.constant 253 : i32
    %61 = tpu.dynamic_rotate %43 by %c253_i32 dim 1 : vector<2x256xf32>, i32 -> vector<2x256xf32>
    %62 = vector.extract_strided_slice %61 {offsets = [0, 0], sizes = [1, 256], strides = [1, 1]} : vector<2x256xf32> to vector<1x256xf32>
    %63 = vector.extract_strided_slice %61 {offsets = [1, 0], sizes = [1, 256], strides = [1, 1]} : vector<2x256xf32> to vector<1x256xf32>
    %c0_21 = arith.constant 0 : index
    %c0_22 = arith.constant 0 : index
    %c0_23 = arith.constant 0 : index
    %64 = vector.load %arg6[%c0_21, %c0_22, %c0_23] : memref<7x14x256xf32, #tpu.memory_space<vmem>>, vector<1x14x256xf32>
    %65 = vector.shape_cast %64 : vector<1x14x256xf32> to vector<14x256xf32>
    %66 = vector.extract_strided_slice %65 {offsets = [0, 0], sizes = [1, 256], strides = [1, 1]} : vector<14x256xf32> to vector<1x256xf32>
    %67 = arith.mulf %66, %45 : vector<1x256xf32>
    %68 = vector.extract_strided_slice %65 {offsets = [1, 0], sizes = [1, 256], strides = [1, 1]} : vector<14x256xf32> to vector<1x256xf32>
    %69 = arith.mulf %68, %46 : vector<1x256xf32>
    %70 = arith.addf %67, %69 : vector<1x256xf32>
    %71 = vector.extract_strided_slice %65 {offsets = [2, 0], sizes = [1, 256], strides = [1, 1]} : vector<14x256xf32> to vector<1x256xf32>
    %72 = arith.mulf %71, %48 : vector<1x256xf32>
    %73 = vector.extract_strided_slice %65 {offsets = [3, 0], sizes = [1, 256], strides = [1, 1]} : vector<14x256xf32> to vector<1x256xf32>
    %74 = arith.mulf %73, %49 : vector<1x256xf32>
    %75 = arith.addf %72, %74 : vector<1x256xf32>
    %76 = arith.addf %70, %75 : vector<1x256xf32>
    %77 = vector.extract_strided_slice %65 {offsets = [4, 0], sizes = [1, 256], strides = [1, 1]} : vector<14x256xf32> to vector<1x256xf32>
    %78 = arith.mulf %77, %51 : vector<1x256xf32>
    %79 = vector.extract_strided_slice %65 {offsets = [5, 0], sizes = [1, 256], strides = [1, 1]} : vector<14x256xf32> to vector<1x256xf32>
    %80 = arith.mulf %79, %52 : vector<1x256xf32>
    %81 = arith.addf %78, %80 : vector<1x256xf32>
    %82 = arith.addf %76, %81 : vector<1x256xf32>
    %83 = vector.extract_strided_slice %65 {offsets = [6, 0], sizes = [1, 256], strides = [1, 1]} : vector<14x256xf32> to vector<1x256xf32>
    %84 = arith.mulf %83, %53 : vector<1x256xf32>
    %85 = vector.extract_strided_slice %65 {offsets = [7, 0], sizes = [1, 256], strides = [1, 1]} : vector<14x256xf32> to vector<1x256xf32>
    %86 = arith.mulf %85, %54 : vector<1x256xf32>
    %87 = arith.addf %84, %86 : vector<1x256xf32>
    %88 = arith.addf %82, %87 : vector<1x256xf32>
    %89 = vector.extract_strided_slice %65 {offsets = [8, 0], sizes = [1, 256], strides = [1, 1]} : vector<14x256xf32> to vector<1x256xf32>
    %90 = arith.mulf %89, %56 : vector<1x256xf32>
    %91 = vector.extract_strided_slice %65 {offsets = [9, 0], sizes = [1, 256], strides = [1, 1]} : vector<14x256xf32> to vector<1x256xf32>
    %92 = arith.mulf %91, %57 : vector<1x256xf32>
    %93 = arith.addf %90, %92 : vector<1x256xf32>
    %94 = arith.addf %88, %93 : vector<1x256xf32>
    %95 = vector.extract_strided_slice %65 {offsets = [10, 0], sizes = [1, 256], strides = [1, 1]} : vector<14x256xf32> to vector<1x256xf32>
    %96 = arith.mulf %95, %59 : vector<1x256xf32>
    %97 = vector.extract_strided_slice %65 {offsets = [11, 0], sizes = [1, 256], strides = [1, 1]} : vector<14x256xf32> to vector<1x256xf32>
    %98 = arith.mulf %97, %60 : vector<1x256xf32>
    %99 = arith.addf %96, %98 : vector<1x256xf32>
    %100 = arith.addf %94, %99 : vector<1x256xf32>
    %101 = vector.extract_strided_slice %65 {offsets = [12, 0], sizes = [1, 256], strides = [1, 1]} : vector<14x256xf32> to vector<1x256xf32>
    %102 = arith.mulf %101, %62 : vector<1x256xf32>
    %103 = vector.extract_strided_slice %65 {offsets = [13, 0], sizes = [1, 256], strides = [1, 1]} : vector<14x256xf32> to vector<1x256xf32>
    %104 = arith.mulf %103, %63 : vector<1x256xf32>
    %105 = arith.addf %102, %104 : vector<1x256xf32>
    %106 = arith.addf %100, %105 : vector<1x256xf32>
    %c48_i32 = arith.constant 48 : i32
    %107 = tpu.dynamic_rotate %106 by %c48_i32 dim 1 : vector<1x256xf32>, i32 -> vector<1x256xf32>
    %c1 = arith.constant 1 : index
    %c0_24 = arith.constant 0 : index
    %c0_25 = arith.constant 0 : index
    %108 = vector.load %arg6[%c1, %c0_24, %c0_25] : memref<7x14x256xf32, #tpu.memory_space<vmem>>, vector<1x14x256xf32>
    %109 = vector.shape_cast %108 : vector<1x14x256xf32> to vector<14x256xf32>
    %110 = vector.extract_strided_slice %109 {offsets = [0, 0], sizes = [1, 256], strides = [1, 1]} : vector<14x256xf32> to vector<1x256xf32>
    %111 = arith.mulf %110, %45 : vector<1x256xf32>
    %112 = vector.extract_strided_slice %109 {offsets = [1, 0], sizes = [1, 256], strides = [1, 1]} : vector<14x256xf32> to vector<1x256xf32>
    %113 = arith.mulf %112, %46 : vector<1x256xf32>
    %114 = arith.addf %111, %113 : vector<1x256xf32>
    %115 = vector.extract_strided_slice %109 {offsets = [2, 0], sizes = [1, 256], strides = [1, 1]} : vector<14x256xf32> to vector<1x256xf32>
    %116 = arith.mulf %115, %48 : vector<1x256xf32>
    %117 = vector.extract_strided_slice %109 {offsets = [3, 0], sizes = [1, 256], strides = [1, 1]} : vector<14x256xf32> to vector<1x256xf32>
    %118 = arith.mulf %117, %49 : vector<1x256xf32>
    %119 = arith.addf %116, %118 : vector<1x256xf32>
    %120 = arith.addf %114, %119 : vector<1x256xf32>
    %121 = vector.extract_strided_slice %109 {offsets = [4, 0], sizes = [1, 256], strides = [1, 1]} : vector<14x256xf32> to vector<1x256xf32>
    %122 = arith.mulf %121, %51 : vector<1x256xf32>
    %123 = vector.extract_strided_slice %109 {offsets = [5, 0], sizes = [1, 256], strides = [1, 1]} : vector<14x256xf32> to vector<1x256xf32>
    %124 = arith.mulf %123, %52 : vector<1x256xf32>
    %125 = arith.addf %122, %124 : vector<1x256xf32>
    %126 = arith.addf %120, %125 : vector<1x256xf32>
    %127 = vector.extract_strided_slice %109 {offsets = [6, 0], sizes = [1, 256], strides = [1, 1]} : vector<14x256xf32> to vector<1x256xf32>
    %128 = arith.mulf %127, %53 : vector<1x256xf32>
    %129 = vector.extract_strided_slice %109 {offsets = [7, 0], sizes = [1, 256], strides = [1, 1]} : vector<14x256xf32> to vector<1x256xf32>
    %130 = arith.mulf %129, %54 : vector<1x256xf32>
    %131 = arith.addf %128, %130 : vector<1x256xf32>
    %132 = arith.addf %126, %131 : vector<1x256xf32>
    %133 = vector.extract_strided_slice %109 {offsets = [8, 0], sizes = [1, 256], strides = [1, 1]} : vector<14x256xf32> to vector<1x256xf32>
    %134 = arith.mulf %133, %56 : vector<1x256xf32>
    %135 = vector.extract_strided_slice %109 {offsets = [9, 0], sizes = [1, 256], strides = [1, 1]} : vector<14x256xf32> to vector<1x256xf32>
    %136 = arith.mulf %135, %57 : vector<1x256xf32>
    %137 = arith.addf %134, %136 : vector<1x256xf32>
    %138 = arith.addf %132, %137 : vector<1x256xf32>
    %139 = vector.extract_strided_slice %109 {offsets = [10, 0], sizes = [1, 256], strides = [1, 1]} : vector<14x256xf32> to vector<1x256xf32>
    %140 = arith.mulf %139, %59 : vector<1x256xf32>
    %141 = vector.extract_strided_slice %109 {offsets = [11, 0], sizes = [1, 256], strides = [1, 1]} : vector<14x256xf32> to vector<1x256xf32>
    %142 = arith.mulf %141, %60 : vector<1x256xf32>
    %143 = arith.addf %140, %142 : vector<1x256xf32>
    %144 = arith.addf %138, %143 : vector<1x256xf32>
    %145 = vector.extract_strided_slice %109 {offsets = [12, 0], sizes = [1, 256], strides = [1, 1]} : vector<14x256xf32> to vector<1x256xf32>
    %146 = arith.mulf %145, %62 : vector<1x256xf32>
    %147 = vector.extract_strided_slice %109 {offsets = [13, 0], sizes = [1, 256], strides = [1, 1]} : vector<14x256xf32> to vector<1x256xf32>
    %148 = arith.mulf %147, %63 : vector<1x256xf32>
    %149 = arith.addf %146, %148 : vector<1x256xf32>
    %150 = arith.addf %144, %149 : vector<1x256xf32>
    %c32_i32 = arith.constant 32 : i32
    %151 = tpu.dynamic_rotate %150 by %c32_i32 dim 1 : vector<1x256xf32>, i32 -> vector<1x256xf32>
    %152 = arith.addf %107, %151 : vector<1x256xf32>
    %c2 = arith.constant 2 : index
    %c0_26 = arith.constant 0 : index
    %c0_27 = arith.constant 0 : index
    %153 = vector.load %arg6[%c2, %c0_26, %c0_27] : memref<7x14x256xf32, #tpu.memory_space<vmem>>, vector<1x14x256xf32>
    %154 = vector.shape_cast %153 : vector<1x14x256xf32> to vector<14x256xf32>
    %155 = vector.extract_strided_slice %154 {offsets = [0, 0], sizes = [1, 256], strides = [1, 1]} : vector<14x256xf32> to vector<1x256xf32>
    %156 = arith.mulf %155, %45 : vector<1x256xf32>
    %157 = vector.extract_strided_slice %154 {offsets = [1, 0], sizes = [1, 256], strides = [1, 1]} : vector<14x256xf32> to vector<1x256xf32>
    %158 = arith.mulf %157, %46 : vector<1x256xf32>
    %159 = arith.addf %156, %158 : vector<1x256xf32>
    %160 = vector.extract_strided_slice %154 {offsets = [2, 0], sizes = [1, 256], strides = [1, 1]} : vector<14x256xf32> to vector<1x256xf32>
    %161 = arith.mulf %160, %48 : vector<1x256xf32>
    %162 = vector.extract_strided_slice %154 {offsets = [3, 0], sizes = [1, 256], strides = [1, 1]} : vector<14x256xf32> to vector<1x256xf32>
    %163 = arith.mulf %162, %49 : vector<1x256xf32>
    %164 = arith.addf %161, %163 : vector<1x256xf32>
    %165 = arith.addf %159, %164 : vector<1x256xf32>
    %166 = vector.extract_strided_slice %154 {offsets = [4, 0], sizes = [1, 256], strides = [1, 1]} : vector<14x256xf32> to vector<1x256xf32>
    %167 = arith.mulf %166, %51 : vector<1x256xf32>
    %168 = vector.extract_strided_slice %154 {offsets = [5, 0], sizes = [1, 256], strides = [1, 1]} : vector<14x256xf32> to vector<1x256xf32>
    %169 = arith.mulf %168, %52 : vector<1x256xf32>
    %170 = arith.addf %167, %169 : vector<1x256xf32>
    %171 = arith.addf %165, %170 : vector<1x256xf32>
    %172 = vector.extract_strided_slice %154 {offsets = [6, 0], sizes = [1, 256], strides = [1, 1]} : vector<14x256xf32> to vector<1x256xf32>
    %173 = arith.mulf %172, %53 : vector<1x256xf32>
    %174 = vector.extract_strided_slice %154 {offsets = [7, 0], sizes = [1, 256], strides = [1, 1]} : vector<14x256xf32> to vector<1x256xf32>
    %175 = arith.mulf %174, %54 : vector<1x256xf32>
    %176 = arith.addf %173, %175 : vector<1x256xf32>
    %177 = arith.addf %171, %176 : vector<1x256xf32>
    %178 = vector.extract_strided_slice %154 {offsets = [8, 0], sizes = [1, 256], strides = [1, 1]} : vector<14x256xf32> to vector<1x256xf32>
    %179 = arith.mulf %178, %56 : vector<1x256xf32>
    %180 = vector.extract_strided_slice %154 {offsets = [9, 0], sizes = [1, 256], strides = [1, 1]} : vector<14x256xf32> to vector<1x256xf32>
    %181 = arith.mulf %180, %57 : vector<1x256xf32>
    %182 = arith.addf %179, %181 : vector<1x256xf32>
    %183 = arith.addf %177, %182 : vector<1x256xf32>
    %184 = vector.extract_strided_slice %154 {offsets = [10, 0], sizes = [1, 256], strides = [1, 1]} : vector<14x256xf32> to vector<1x256xf32>
    %185 = arith.mulf %184, %59 : vector<1x256xf32>
    %186 = vector.extract_strided_slice %154 {offsets = [11, 0], sizes = [1, 256], strides = [1, 1]} : vector<14x256xf32> to vector<1x256xf32>
    %187 = arith.mulf %186, %60 : vector<1x256xf32>
    %188 = arith.addf %185, %187 : vector<1x256xf32>
    %189 = arith.addf %183, %188 : vector<1x256xf32>
    %190 = vector.extract_strided_slice %154 {offsets = [12, 0], sizes = [1, 256], strides = [1, 1]} : vector<14x256xf32> to vector<1x256xf32>
    %191 = arith.mulf %190, %62 : vector<1x256xf32>
    %192 = vector.extract_strided_slice %154 {offsets = [13, 0], sizes = [1, 256], strides = [1, 1]} : vector<14x256xf32> to vector<1x256xf32>
    %193 = arith.mulf %192, %63 : vector<1x256xf32>
    %194 = arith.addf %191, %193 : vector<1x256xf32>
    %195 = arith.addf %189, %194 : vector<1x256xf32>
    %c16_i32 = arith.constant 16 : i32
    %196 = tpu.dynamic_rotate %195 by %c16_i32 dim 1 : vector<1x256xf32>, i32 -> vector<1x256xf32>
    %197 = arith.addf %152, %196 : vector<1x256xf32>
    %c3 = arith.constant 3 : index
    %c0_28 = arith.constant 0 : index
    %c0_29 = arith.constant 0 : index
    %198 = vector.load %arg6[%c3, %c0_28, %c0_29] : memref<7x14x256xf32, #tpu.memory_space<vmem>>, vector<1x14x256xf32>
    %199 = vector.shape_cast %198 : vector<1x14x256xf32> to vector<14x256xf32>
    %200 = vector.extract_strided_slice %199 {offsets = [0, 0], sizes = [1, 256], strides = [1, 1]} : vector<14x256xf32> to vector<1x256xf32>
    %201 = arith.mulf %200, %45 : vector<1x256xf32>
    %202 = vector.extract_strided_slice %199 {offsets = [1, 0], sizes = [1, 256], strides = [1, 1]} : vector<14x256xf32> to vector<1x256xf32>
    %203 = arith.mulf %202, %46 : vector<1x256xf32>
    %204 = arith.addf %201, %203 : vector<1x256xf32>
    %205 = vector.extract_strided_slice %199 {offsets = [2, 0], sizes = [1, 256], strides = [1, 1]} : vector<14x256xf32> to vector<1x256xf32>
    %206 = arith.mulf %205, %48 : vector<1x256xf32>
    %207 = vector.extract_strided_slice %199 {offsets = [3, 0], sizes = [1, 256], strides = [1, 1]} : vector<14x256xf32> to vector<1x256xf32>
    %208 = arith.mulf %207, %49 : vector<1x256xf32>
    %209 = arith.addf %206, %208 : vector<1x256xf32>
    %210 = arith.addf %204, %209 : vector<1x256xf32>
    %211 = vector.extract_strided_slice %199 {offsets = [4, 0], sizes = [1, 256], strides = [1, 1]} : vector<14x256xf32> to vector<1x256xf32>
    %212 = arith.mulf %211, %51 : vector<1x256xf32>
    %213 = vector.extract_strided_slice %199 {offsets = [5, 0], sizes = [1, 256], strides = [1, 1]} : vector<14x256xf32> to vector<1x256xf32>
    %214 = arith.mulf %213, %52 : vector<1x256xf32>
    %215 = arith.addf %212, %214 : vector<1x256xf32>
    %216 = arith.addf %210, %215 : vector<1x256xf32>
    %217 = vector.extract_strided_slice %199 {offsets = [6, 0], sizes = [1, 256], strides = [1, 1]} : vector<14x256xf32> to vector<1x256xf32>
    %218 = arith.mulf %217, %53 : vector<1x256xf32>
    %219 = vector.extract_strided_slice %199 {offsets = [7, 0], sizes = [1, 256], strides = [1, 1]} : vector<14x256xf32> to vector<1x256xf32>
    %220 = arith.mulf %219, %54 : vector<1x256xf32>
    %221 = arith.addf %218, %220 : vector<1x256xf32>
    %222 = arith.addf %216, %221 : vector<1x256xf32>
    %223 = vector.extract_strided_slice %199 {offsets = [8, 0], sizes = [1, 256], strides = [1, 1]} : vector<14x256xf32> to vector<1x256xf32>
    %224 = arith.mulf %223, %56 : vector<1x256xf32>
    %225 = vector.extract_strided_slice %199 {offsets = [9, 0], sizes = [1, 256], strides = [1, 1]} : vector<14x256xf32> to vector<1x256xf32>
    %226 = arith.mulf %225, %57 : vector<1x256xf32>
    %227 = arith.addf %224, %226 : vector<1x256xf32>
    %228 = arith.addf %222, %227 : vector<1x256xf32>
    %229 = vector.extract_strided_slice %199 {offsets = [10, 0], sizes = [1, 256], strides = [1, 1]} : vector<14x256xf32> to vector<1x256xf32>
    %230 = arith.mulf %229, %59 : vector<1x256xf32>
    %231 = vector.extract_strided_slice %199 {offsets = [11, 0], sizes = [1, 256], strides = [1, 1]} : vector<14x256xf32> to vector<1x256xf32>
    %232 = arith.mulf %231, %60 : vector<1x256xf32>
    %233 = arith.addf %230, %232 : vector<1x256xf32>
    %234 = arith.addf %228, %233 : vector<1x256xf32>
    %235 = vector.extract_strided_slice %199 {offsets = [12, 0], sizes = [1, 256], strides = [1, 1]} : vector<14x256xf32> to vector<1x256xf32>
    %236 = arith.mulf %235, %62 : vector<1x256xf32>
    %237 = vector.extract_strided_slice %199 {offsets = [13, 0], sizes = [1, 256], strides = [1, 1]} : vector<14x256xf32> to vector<1x256xf32>
    %238 = arith.mulf %237, %63 : vector<1x256xf32>
    %239 = arith.addf %236, %238 : vector<1x256xf32>
    %240 = arith.addf %234, %239 : vector<1x256xf32>
    %241 = arith.addf %197, %240 : vector<1x256xf32>
    %c4 = arith.constant 4 : index
    %c0_30 = arith.constant 0 : index
    %c0_31 = arith.constant 0 : index
    %242 = vector.load %arg6[%c4, %c0_30, %c0_31] : memref<7x14x256xf32, #tpu.memory_space<vmem>>, vector<1x14x256xf32>
    %243 = vector.shape_cast %242 : vector<1x14x256xf32> to vector<14x256xf32>
    %244 = vector.extract_strided_slice %243 {offsets = [0, 0], sizes = [1, 256], strides = [1, 1]} : vector<14x256xf32> to vector<1x256xf32>
    %245 = arith.mulf %244, %45 : vector<1x256xf32>
    %246 = vector.extract_strided_slice %243 {offsets = [1, 0], sizes = [1, 256], strides = [1, 1]} : vector<14x256xf32> to vector<1x256xf32>
    %247 = arith.mulf %246, %46 : vector<1x256xf32>
    %248 = arith.addf %245, %247 : vector<1x256xf32>
    %249 = vector.extract_strided_slice %243 {offsets = [2, 0], sizes = [1, 256], strides = [1, 1]} : vector<14x256xf32> to vector<1x256xf32>
    %250 = arith.mulf %249, %48 : vector<1x256xf32>
    %251 = vector.extract_strided_slice %243 {offsets = [3, 0], sizes = [1, 256], strides = [1, 1]} : vector<14x256xf32> to vector<1x256xf32>
    %252 = arith.mulf %251, %49 : vector<1x256xf32>
    %253 = arith.addf %250, %252 : vector<1x256xf32>
    %254 = arith.addf %248, %253 : vector<1x256xf32>
    %255 = vector.extract_strided_slice %243 {offsets = [4, 0], sizes = [1, 256], strides = [1, 1]} : vector<14x256xf32> to vector<1x256xf32>
    %256 = arith.mulf %255, %51 : vector<1x256xf32>
    %257 = vector.extract_strided_slice %243 {offsets = [5, 0], sizes = [1, 256], strides = [1, 1]} : vector<14x256xf32> to vector<1x256xf32>
    %258 = arith.mulf %257, %52 : vector<1x256xf32>
    %259 = arith.addf %256, %258 : vector<1x256xf32>
    %260 = arith.addf %254, %259 : vector<1x256xf32>
    %261 = vector.extract_strided_slice %243 {offsets = [6, 0], sizes = [1, 256], strides = [1, 1]} : vector<14x256xf32> to vector<1x256xf32>
    %262 = arith.mulf %261, %53 : vector<1x256xf32>
    %263 = vector.extract_strided_slice %243 {offsets = [7, 0], sizes = [1, 256], strides = [1, 1]} : vector<14x256xf32> to vector<1x256xf32>
    %264 = arith.mulf %263, %54 : vector<1x256xf32>
    %265 = arith.addf %262, %264 : vector<1x256xf32>
    %266 = arith.addf %260, %265 : vector<1x256xf32>
    %267 = vector.extract_strided_slice %243 {offsets = [8, 0], sizes = [1, 256], strides = [1, 1]} : vector<14x256xf32> to vector<1x256xf32>
    %268 = arith.mulf %267, %56 : vector<1x256xf32>
    %269 = vector.extract_strided_slice %243 {offsets = [9, 0], sizes = [1, 256], strides = [1, 1]} : vector<14x256xf32> to vector<1x256xf32>
    %270 = arith.mulf %269, %57 : vector<1x256xf32>
    %271 = arith.addf %268, %270 : vector<1x256xf32>
    %272 = arith.addf %266, %271 : vector<1x256xf32>
    %273 = vector.extract_strided_slice %243 {offsets = [10, 0], sizes = [1, 256], strides = [1, 1]} : vector<14x256xf32> to vector<1x256xf32>
    %274 = arith.mulf %273, %59 : vector<1x256xf32>
    %275 = vector.extract_strided_slice %243 {offsets = [11, 0], sizes = [1, 256], strides = [1, 1]} : vector<14x256xf32> to vector<1x256xf32>
    %276 = arith.mulf %275, %60 : vector<1x256xf32>
    %277 = arith.addf %274, %276 : vector<1x256xf32>
    %278 = arith.addf %272, %277 : vector<1x256xf32>
    %279 = vector.extract_strided_slice %243 {offsets = [12, 0], sizes = [1, 256], strides = [1, 1]} : vector<14x256xf32> to vector<1x256xf32>
    %280 = arith.mulf %279, %62 : vector<1x256xf32>
    %281 = vector.extract_strided_slice %243 {offsets = [13, 0], sizes = [1, 256], strides = [1, 1]} : vector<14x256xf32> to vector<1x256xf32>
    %282 = arith.mulf %281, %63 : vector<1x256xf32>
    %283 = arith.addf %280, %282 : vector<1x256xf32>
    %284 = arith.addf %278, %283 : vector<1x256xf32>
    %c240_i32 = arith.constant 240 : i32
    %285 = tpu.dynamic_rotate %284 by %c240_i32 dim 1 : vector<1x256xf32>, i32 -> vector<1x256xf32>
    %286 = arith.addf %241, %285 : vector<1x256xf32>
    %c5 = arith.constant 5 : index
    %c0_32 = arith.constant 0 : index
    %c0_33 = arith.constant 0 : index
    %287 = vector.load %arg6[%c5, %c0_32, %c0_33] : memref<7x14x256xf32, #tpu.memory_space<vmem>>, vector<1x14x256xf32>
    %288 = vector.shape_cast %287 : vector<1x14x256xf32> to vector<14x256xf32>
    %289 = vector.extract_strided_slice %288 {offsets = [0, 0], sizes = [1, 256], strides = [1, 1]} : vector<14x256xf32> to vector<1x256xf32>
    %290 = arith.mulf %289, %45 : vector<1x256xf32>
    %291 = vector.extract_strided_slice %288 {offsets = [1, 0], sizes = [1, 256], strides = [1, 1]} : vector<14x256xf32> to vector<1x256xf32>
    %292 = arith.mulf %291, %46 : vector<1x256xf32>
    %293 = arith.addf %290, %292 : vector<1x256xf32>
    %294 = vector.extract_strided_slice %288 {offsets = [2, 0], sizes = [1, 256], strides = [1, 1]} : vector<14x256xf32> to vector<1x256xf32>
    %295 = arith.mulf %294, %48 : vector<1x256xf32>
    %296 = vector.extract_strided_slice %288 {offsets = [3, 0], sizes = [1, 256], strides = [1, 1]} : vector<14x256xf32> to vector<1x256xf32>
    %297 = arith.mulf %296, %49 : vector<1x256xf32>
    %298 = arith.addf %295, %297 : vector<1x256xf32>
    %299 = arith.addf %293, %298 : vector<1x256xf32>
    %300 = vector.extract_strided_slice %288 {offsets = [4, 0], sizes = [1, 256], strides = [1, 1]} : vector<14x256xf32> to vector<1x256xf32>
    %301 = arith.mulf %300, %51 : vector<1x256xf32>
    %302 = vector.extract_strided_slice %288 {offsets = [5, 0], sizes = [1, 256], strides = [1, 1]} : vector<14x256xf32> to vector<1x256xf32>
    %303 = arith.mulf %302, %52 : vector<1x256xf32>
    %304 = arith.addf %301, %303 : vector<1x256xf32>
    %305 = arith.addf %299, %304 : vector<1x256xf32>
    %306 = vector.extract_strided_slice %288 {offsets = [6, 0], sizes = [1, 256], strides = [1, 1]} : vector<14x256xf32> to vector<1x256xf32>
    %307 = arith.mulf %306, %53 : vector<1x256xf32>
    %308 = vector.extract_strided_slice %288 {offsets = [7, 0], sizes = [1, 256], strides = [1, 1]} : vector<14x256xf32> to vector<1x256xf32>
    %309 = arith.mulf %308, %54 : vector<1x256xf32>
    %310 = arith.addf %307, %309 : vector<1x256xf32>
    %311 = arith.addf %305, %310 : vector<1x256xf32>
    %312 = vector.extract_strided_slice %288 {offsets = [8, 0], sizes = [1, 256], strides = [1, 1]} : vector<14x256xf32> to vector<1x256xf32>
    %313 = arith.mulf %312, %56 : vector<1x256xf32>
    %314 = vector.extract_strided_slice %288 {offsets = [9, 0], sizes = [1, 256], strides = [1, 1]} : vector<14x256xf32> to vector<1x256xf32>
    %315 = arith.mulf %314, %57 : vector<1x256xf32>
    %316 = arith.addf %313, %315 : vector<1x256xf32>
    %317 = arith.addf %311, %316 : vector<1x256xf32>
    %318 = vector.extract_strided_slice %288 {offsets = [10, 0], sizes = [1, 256], strides = [1, 1]} : vector<14x256xf32> to vector<1x256xf32>
    %319 = arith.mulf %318, %59 : vector<1x256xf32>
    %320 = vector.extract_strided_slice %288 {offsets = [11, 0], sizes = [1, 256], strides = [1, 1]} : vector<14x256xf32> to vector<1x256xf32>
    %321 = arith.mulf %320, %60 : vector<1x256xf32>
    %322 = arith.addf %319, %321 : vector<1x256xf32>
    %323 = arith.addf %317, %322 : vector<1x256xf32>
    %324 = vector.extract_strided_slice %288 {offsets = [12, 0], sizes = [1, 256], strides = [1, 1]} : vector<14x256xf32> to vector<1x256xf32>
    %325 = arith.mulf %324, %62 : vector<1x256xf32>
    %326 = vector.extract_strided_slice %288 {offsets = [13, 0], sizes = [1, 256], strides = [1, 1]} : vector<14x256xf32> to vector<1x256xf32>
    %327 = arith.mulf %326, %63 : vector<1x256xf32>
    %328 = arith.addf %325, %327 : vector<1x256xf32>
    %329 = arith.addf %323, %328 : vector<1x256xf32>
    %c224_i32 = arith.constant 224 : i32
    %330 = tpu.dynamic_rotate %329 by %c224_i32 dim 1 : vector<1x256xf32>, i32 -> vector<1x256xf32>
    %331 = arith.addf %286, %330 : vector<1x256xf32>
    %c6 = arith.constant 6 : index
    %c0_34 = arith.constant 0 : index
    %c0_35 = arith.constant 0 : index
    %332 = vector.load %arg6[%c6, %c0_34, %c0_35] : memref<7x14x256xf32, #tpu.memory_space<vmem>>, vector<1x14x256xf32>
    %333 = vector.shape_cast %332 : vector<1x14x256xf32> to vector<14x256xf32>
    %334 = vector.extract_strided_slice %333 {offsets = [0, 0], sizes = [1, 256], strides = [1, 1]} : vector<14x256xf32> to vector<1x256xf32>
    %335 = arith.mulf %334, %45 : vector<1x256xf32>
    %336 = vector.extract_strided_slice %333 {offsets = [1, 0], sizes = [1, 256], strides = [1, 1]} : vector<14x256xf32> to vector<1x256xf32>
    %337 = arith.mulf %336, %46 : vector<1x256xf32>
    %338 = arith.addf %335, %337 : vector<1x256xf32>
    %339 = vector.extract_strided_slice %333 {offsets = [2, 0], sizes = [1, 256], strides = [1, 1]} : vector<14x256xf32> to vector<1x256xf32>
    %340 = arith.mulf %339, %48 : vector<1x256xf32>
    %341 = vector.extract_strided_slice %333 {offsets = [3, 0], sizes = [1, 256], strides = [1, 1]} : vector<14x256xf32> to vector<1x256xf32>
    %342 = arith.mulf %341, %49 : vector<1x256xf32>
    %343 = arith.addf %340, %342 : vector<1x256xf32>
    %344 = arith.addf %338, %343 : vector<1x256xf32>
    %345 = vector.extract_strided_slice %333 {offsets = [4, 0], sizes = [1, 256], strides = [1, 1]} : vector<14x256xf32> to vector<1x256xf32>
    %346 = arith.mulf %345, %51 : vector<1x256xf32>
    %347 = vector.extract_strided_slice %333 {offsets = [5, 0], sizes = [1, 256], strides = [1, 1]} : vector<14x256xf32> to vector<1x256xf32>
    %348 = arith.mulf %347, %52 : vector<1x256xf32>
    %349 = arith.addf %346, %348 : vector<1x256xf32>
    %350 = arith.addf %344, %349 : vector<1x256xf32>
    %351 = vector.extract_strided_slice %333 {offsets = [6, 0], sizes = [1, 256], strides = [1, 1]} : vector<14x256xf32> to vector<1x256xf32>
    %352 = arith.mulf %351, %53 : vector<1x256xf32>
    %353 = vector.extract_strided_slice %333 {offsets = [7, 0], sizes = [1, 256], strides = [1, 1]} : vector<14x256xf32> to vector<1x256xf32>
    %354 = arith.mulf %353, %54 : vector<1x256xf32>
    %355 = arith.addf %352, %354 : vector<1x256xf32>
    %356 = arith.addf %350, %355 : vector<1x256xf32>
    %357 = vector.extract_strided_slice %333 {offsets = [8, 0], sizes = [1, 256], strides = [1, 1]} : vector<14x256xf32> to vector<1x256xf32>
    %358 = arith.mulf %357, %56 : vector<1x256xf32>
    %359 = vector.extract_strided_slice %333 {offsets = [9, 0], sizes = [1, 256], strides = [1, 1]} : vector<14x256xf32> to vector<1x256xf32>
    %360 = arith.mulf %359, %57 : vector<1x256xf32>
    %361 = arith.addf %358, %360 : vector<1x256xf32>
    %362 = arith.addf %356, %361 : vector<1x256xf32>
    %363 = vector.extract_strided_slice %333 {offsets = [10, 0], sizes = [1, 256], strides = [1, 1]} : vector<14x256xf32> to vector<1x256xf32>
    %364 = arith.mulf %363, %59 : vector<1x256xf32>
    %365 = vector.extract_strided_slice %333 {offsets = [11, 0], sizes = [1, 256], strides = [1, 1]} : vector<14x256xf32> to vector<1x256xf32>
    %366 = arith.mulf %365, %60 : vector<1x256xf32>
    %367 = arith.addf %364, %366 : vector<1x256xf32>
    %368 = arith.addf %362, %367 : vector<1x256xf32>
    %369 = vector.extract_strided_slice %333 {offsets = [12, 0], sizes = [1, 256], strides = [1, 1]} : vector<14x256xf32> to vector<1x256xf32>
    %370 = arith.mulf %369, %62 : vector<1x256xf32>
    %371 = vector.extract_strided_slice %333 {offsets = [13, 0], sizes = [1, 256], strides = [1, 1]} : vector<14x256xf32> to vector<1x256xf32>
    %372 = arith.mulf %371, %63 : vector<1x256xf32>
    %373 = arith.addf %370, %372 : vector<1x256xf32>
    %374 = arith.addf %368, %373 : vector<1x256xf32>
    %c208_i32 = arith.constant 208 : i32
    %375 = tpu.dynamic_rotate %374 by %c208_i32 dim 1 : vector<1x256xf32>, i32 -> vector<1x256xf32>
    %376 = arith.addf %331, %375 : vector<1x256xf32>
    %c0_36 = arith.constant 0 : index
    %377 = memref.load %arg7[%c0_36] : memref<1xf32, #tpu.memory_space<smem>>
    %378 = vector.broadcast %377 : f32 to vector<1x256xf32>
    %379 = arith.addf %376, %378 : vector<1x256xf32>
    %cst_37 = arith.constant 0.000000e+00 : f32
    %380 = vector.broadcast %cst_37 : f32 to vector<1x256xf32>
    %381 = arith.subf %380, %379 : vector<1x256xf32>
    %382 = math.exp %381 : vector<1x256xf32>
    %cst_38 = arith.constant 1.000000e+00 : f32
    %383 = vector.broadcast %cst_38 : f32 to vector<1x256xf32>
    %384 = arith.addf %383, %382 : vector<1x256xf32>
    %cst_39 = arith.constant 1.000000e+00 : f32
    %385 = vector.broadcast %cst_39 : f32 to vector<1x256xf32>
    %386 = arith.divf %385, %384 : vector<1x256xf32>
    %387 = vector.shape_cast %34 : vector<1x32x256xf32> to vector<32x256xf32>
    %388 = vector.broadcast %386 : vector<1x256xf32> to vector<32x256xf32>
    %389 = arith.mulf %387, %388 : vector<32x256xf32>
    %c0_40 = arith.constant 0 : index
    %c0_41 = arith.constant 0 : index
    %c0_42 = arith.constant 0 : index
    %390 = vector.load %arg8[%c0_40, %c0_41, %c0_42] : memref<1x32x256xf32, #tpu.memory_space<vmem>>, vector<1x32x256xf32>
    %391 = vector.shape_cast %390 : vector<1x32x256xf32> to vector<32x256xf32>
    %392 = vector.shape_cast %389 : vector<32x256xf32> to vector<1x32x256xf32>
    tpu.vector_store %arg8[%c0_40, %c0_41, %c0_42], %392 {strides = array<i32>} : memref<1x32x256xf32, #tpu.memory_space<vmem>>, vector<1x32x256xf32>,
    return
  }
  func.func @transform_0(%arg0: i32) -> (i32, i32, i32) {
    %c0_i32 = arith.constant 0 : i32
    %c0_i32_0 = arith.constant 0 : i32
    %c0_i32_1 = arith.constant 0 : i32
    return %arg0, %c0_i32, %c0_i32_0 : i32, i32, i32
  }
  func.func @transform_1(%arg0: i32) -> (i32, i32) {
    %c0_i32 = arith.constant 0 : i32
    %c0_i32_0 = arith.constant 0 : i32
    %c0_i32_1 = arith.constant 0 : i32
    return %c0_i32, %c0_i32_0 : i32, i32
  }
  func.func @transform_2(%arg0: i32) -> (i32, i32) {
    %c0_i32 = arith.constant 0 : i32
    %c0_i32_0 = arith.constant 0 : i32
    %c0_i32_1 = arith.constant 0 : i32
    return %c0_i32, %c0_i32_0 : i32, i32
  }
  func.func @transform_3(%arg0: i32) -> (i32, i32) {
    %c0_i32 = arith.constant 0 : i32
    %c0_i32_0 = arith.constant 0 : i32
    %c0_i32_1 = arith.constant 0 : i32
    return %c0_i32, %c0_i32_0 : i32, i32
  }
  func.func @transform_4(%arg0: i32) -> (i32, i32) {
    %c0_i32 = arith.constant 0 : i32
    %c0_i32_0 = arith.constant 0 : i32
    %c0_i32_1 = arith.constant 0 : i32
    return %c0_i32, %c0_i32_0 : i32, i32
  }
  func.func @transform_5(%arg0: i32) -> (i32, i32, i32) {
    %c0_i32 = arith.constant 0 : i32
    %c0_i32_0 = arith.constant 0 : i32
    %c0_i32_1 = arith.constant 0 : i32
    %c0_i32_2 = arith.constant 0 : i32
    return %c0_i32, %c0_i32_0, %c0_i32_1 : i32, i32, i32
  }
  func.func @transform_6(%arg0: i32) -> i32 {
    %c0_i32 = arith.constant 0 : i32
    %c0_i32_0 = arith.constant 0 : i32
    return %c0_i32 : i32
  }
  func.func @transform_7(%arg0: i32) -> (i32, i32, i32) {
    %c0_i32 = arith.constant 0 : i32
    %c0_i32_0 = arith.constant 0 : i32
    %c0_i32_1 = arith.constant 0 : i32
    return %arg0, %c0_i32, %c0_i32_0 : i32, i32, i32
  }
}

</mosaic_0001>

<bundles_post_ra>
// kernel: tpu_custom_call.1
= control target key start
LH: loop header
LB: loop body
LE: loop exit
PB: predicated region body
PF: predicated region fallthrough
CT: control target
= control target key end

     0   :  { %s2838_s0 = inlined_call_operand.hbm [shape: f32[2,32,256], index: 0, kind: input, shape index: {}]   ;;  %s2839_s1 = inlined_call_operand.vmem [shape: f32[2,32], index: 1, kind: input, shape index: {}]   ;;  %s2840_s2 = inlined_call_operand.vmem [shape: f32[2,1], index: 2, kind: input, shape index: {}]   ;;  %s2841_s3 = inlined_call_operand.vmem [shape: f32[32,2], index: 3, kind: input, shape index: {}]   ;;  %s2842_s4 = inlined_call_operand.vmem [shape: f32[32,1], index: 4, kind: input, shape index: {}]   ;;  %s2843_s5 = inlined_call_operand.hbm [shape: f32[7,14,256], index: 5, kind: input, shape index: {}]   ;;  %s2844_s6 = inlined_call_operand.<no memory space> [shape: f32[1], index: 6, kind: input, shape index: {}]   ;;  %s2845_s7 = inlined_call_operand.hbm [shape: f32[2,32,256], index: 7, kind: output, shape index: {}]  }
   0x1   :  { %12 = sst [smem:[#allocation2]] %s2844_s6 }
   0x2   :  { %13 = vsyncpa [#allocation4], 0 }
   0x3   :  { %15 = vsyncpa [#allocation4 + $0x1], 0 }
   0x4   :  { %16 = vsyncpa [#allocation7], 0 }
   0x5   :  { %17 = vsyncpa [#allocation5], 0 }
   0x6   :  { %19 = vsyncpa [#allocation5 + $0x1], 0  ;;  %s2118_s26 = smov 0   ;;  %s2120_s27 = smov 0  }
   0x7   :  { %s2122_s28 = smov 0   ;;  %s2124_s29 = smov 0  }
   0x8 LB: > { %s2139_s6 = sadd.s32 4294967295, %s2051_s29   ;;  %s1762_s30 = sadd.s32 4294967294, %s2051_s29   ;;  %s2051_s29 = sphi %s2124_s29, %s2972_s29   ;;  %s2047_s28 = sphi %s2122_s28, %s2971_s28   ;;  %s2043_s27 = sphi %s2120_s27, %s2970_s27   ;;  %s2039_s26 = sphi %s2118_s26, %s2969_s26  }
   0x9   : > { %p45_p0 = scmp.ne.s32.totalorder %s2043_s27, %s2039_s26  ;;  %p2846_p1 = scmp.eq.s32.totalorder %s2139_s6, 0 }
   0xa   : > { %p201_p3 = scmp.eq.s32.totalorder %s1762_s30, 1  ;;  %p1763_p5 = scmp.ge.s32.totalorder %s2051_s29, 1 }
   0xb   : > { %p2148_p4 = por %p2846_p1, %p45_p0  ;;  %p208_p7 = scmp.lt.s32.totalorder %s2051_s29, 3 }
   0xc   : > { %p2153_p6 = por %p201_p3, %p45_p0  ;;  %s2053_s11 = smov [#allocation6]  }
   0xd   : > { %s2883_s8 = scalar_select %p2148_p4, 1, 0 }
   0xe   : > { %s2884_s9 = scalar_select %p2153_p6, 1, 0 }
   0xf   : > { %p2158_p8 = pnand %p1763_p5, %p208_p7  ;;  %s232_s12 = sshll.u32 %s2053_s11, 4  ;;  %s2162_s12 = int_to_ptr.vmem [resolvable:$true] %s232_s12 }
  0x10   : > { %s2174_s14 = sadd.s32 1, %s2051_s29   ;;  %s32_s15 = sadd.s32 1, %s2047_s28 }
  0x11   : > { %s2885_s10 = scalar_select %p2158_p8, 1, 0 }
  0x12   : > { %p1829_p9 = pneg %p2158_p8  ;;  %s29_s16 = ssub.s32 %s2051_s29, %s2174_s14 }
  0x13   : > { %s1923_s19 = scalar_lea.hbm %s2843_s5, 3584 }
  0x14   : > { %p2169_p11 = pnand %p1829_p9, %p2846_p1  ;;  %p1924_p12 = scmp.ne.s32.totalorder %s2843_s5, %s1923_s19 }
  0x15   : > { %p1930_p5 = scmp.lt.u32.totalorder %s1923_s19, %s2843_s5 }
  0x16   : > { %p1925_p13 = pneg %p2169_p11 }
  0x18   : > { %p1926_p0 = pnand %p1925_p13, %p1924_p12 }
  0x1a   : > { %p1927_p3 = pneg %p1926_p0 }
  0x1c   : > { %p1932_p7 = pnand %p1930_p5, %p1927_p3 }
  0x1e   : > { %1935 = shalt.err (!%p1932_p7)
}
  0x1f   : > { %s1936_s24 = scalar_lea.vmem %s2162_s12, 3584  ;;  %p1944_p2 = scmp.lt.s32.totalorder %s2162_s12, %s2162_s12 }
  0x20   : > { %p1937_p9 = scmp.ne.s32.totalorder %s2162_s12, %s1936_s24  ;;  %p1945_p6 = scmp.lt.s32.totalorder %s1936_s24, %s1936_s24 }
  0x22   : > { %p1939_p10 = pnand %p1937_p9, %p1925_p13  ;;  %p1946_p4 = por %p1945_p6, %p1944_p2 }
  0x24   : > { %p1940_p1 = pneg %p1939_p10 }
  0x26   : > { %p1947_p8 = pnand %p1946_p4, %p1940_p1 }
  0x28   : > { %1950 = shalt.err (!%p1947_p8)
}
  0x29   : > { %s2054_s25 = smov 256   ;;  %s2055_s30 = smov 16  }
  0x2a   : > { %1832 = dma.hbm_to_vmem [thread:$0]  (!%p2169_p11), %s2843_s5, 3584, %s2162_s12, [#allocation7], %s2054_s25, %s2054_s25, %s2055_s30  }
  0x2b   : > { %p30_p1 = scmp.eq.s32.totalorder %s29_s16, 0  ;;  %p39_p2 = scmp.ne.s32.totalorder %s2047_s28, %s2043_s27 }
  0x2c   : > { %p40_p4 = scmp.eq.s32.totalorder %s2051_s29, 0  ;;  %p1842_p6 = scmp.lt.s32.totalorder %s2051_s29, 2 }
  0x2d   : > { %s2208_s18 = scalar_select %p30_p1, %s2047_s28, %s32_s15  }
  0x2e   : > { %p41_p8 = por %p40_p4, %p39_p2  ;;  %p2887_p10 = scmp.eq.s32.totalorder %s2139_s6, 1 }
  0x2f   : > { %s249_s13 = sand.u32 1, %s2047_s28   ;;  %s1784_s20 = sshll.u32 %s2051_s29, 10 }
  0x30   : > { %p2212_p12 = por %p2887_p10, %p39_p2  ;;  %s1766_s21 = sshll.u32 %s249_s13, 6 }
  0x31   : > { %s2221_s24 = scalar_lea.hbm %s2838_s0, %s1784_s20  ;;  %s253_s12 = scalar_lea.vmem [#allocation3], %s1766_s21 }
  0x32   : > { %s260_s15 = sshll.u32 %s253_s12, 4  ;;  %p2223_p11 = pnand %p1842_p6, %p41_p8  ;;  %s2227_s15 = int_to_ptr.vmem [resolvable:$true] %s260_s15 }
  0x33   : > { %s2229_s11 = scalar_lea.sflag [#allocation4], %s249_s13  ;;  %s1951_s17 = scalar_lea.hbm %s2221_s24, 1024 }
  0x34   : > { %p1952_p13 = scmp.ne.s32.totalorder %s2221_s24, %s1951_s17  ;;  %p1953_p0 = pneg %p2223_p11 }
  0x35   : > { %s1956_s22 = scalar_lea.hbm %s2838_s0, 2048  ;;  %p1957_p7 = scmp.lt.u32.totalorder %s2221_s24, %s2838_s0 }
  0x36   : > { %p1954_p3 = pnand %p1953_p0, %p1952_p13  ;;  %p1958_p9 = scmp.lt.u32.totalorder %s1956_s22, %s1951_s17 }
  0x37   : > { %p1960_p2 = scmp.lt.u32.totalorder %s1951_s17, %s2221_s24 }
  0x38   : > { %p1955_p5 = pneg %p1954_p3  ;;  %p1959_p1 = por %p1958_p9, %p1957_p7 }
  0x3a   : > { %p1961_p4 = por %p1960_p2, %p1959_p1 }
  0x3c   : > { %p1962_p6 = pnand %p1961_p4, %p1955_p5 }
  0x3e   : > { %1965 = shalt.err (!%p1962_p6)
}
  0x3f   : > { %s1966_s13 = scalar_lea.vmem %s2227_s15, 1024  ;;  %s2056_s20 = smov [#allocation3]  }
  0x40   : > { %p1967_p8 = scmp.ne.s32.totalorder %s2227_s15, %s1966_s13  ;;  %s1971_s21 = sshll.u32 %s2056_s20, 4  ;;  %s1972_s21 = int_to_ptr.vmem [resolvable:$false] %s1971_s21 }
  0x41   : > { %s1973_s23 = scalar_lea.vmem %s1972_s21, 2048  ;;  %p1974_p3 = scmp.lt.s32.totalorder %s2227_s15, %s1972_s21 }
  0x42   : > { %p1969_p10 = pnand %p1967_p8, %p1953_p0  ;;  %p1975_p7 = scmp.lt.s32.totalorder %s1973_s23, %s1966_s13 }
  0x44   : > { %p1970_p13 = pneg %p1969_p10  ;;  %p1976_p9 = por %p1975_p7, %p1974_p3 }
  0x46   : > { %p1977_p1 = pnand %p1976_p9, %p1970_p13 }
  0x48   : > { %1980 = shalt.err (!%p1977_p1)
}
  0x49   : > { %1836 = dma.hbm_to_vmem [thread:$0]  (!%p2223_p11), %s2221_s24, 1024, %s2227_s15, %s2229_s11, %s2054_s25, %s2054_s25, %s2055_s30  }
  0x4a   : > { %p2890_p0 = scmp.ne.s32.totalorder %s2885_s10, 0 }
  0x4c   : > { %272 = sbr.rel (%p2890_p0) target bundleno = 1380 (0x564), region = 48 }
  0x53   : > { %s2263_s17 = sand.u32 1, %s2043_s27   ;;  %p2891_p5 = scmp.ne.s32.totalorder %s2883_s8, 0 }
  0x54   : > { %s1770_s22 = sshll.u32 %s2263_s17, 6  ;;  %s275_s12 = scalar_lea.sflag [#allocation4], %s2263_s17 }
  0x55   : > { %s278_s16 = scalar_lea.vmem [#allocation3], %s1770_s22 }
  0x56   : > { %2026 = dma.done.wait (%p2891_p5), %s275_s12, 1024  }
  0x57   : > { %2028 = vsyncadd (%p2891_p5), %s275_s12, 4294966272  ;;  %p2892_p11 = scmp.eq.s32.totalorder %s2139_s6, 0 }
  0x59   : > { %2030 = dma.done.wait (%p2892_p11), [#allocation7], 3584   ;;  %p2893_p2 = pmov %p2892_p11 }
  0x5a   : > { %v2277_v0 = vld [vmem:[%s278_s16] sm:$0xff]  ;;  %v2279_v1 = vld [vmem:[%s278_s16 + $0x8] sm:$0xff]  ;;  %v2281_v2 = vld [vmem:[%s278_s16 + $0x10] sm:$0xff]  ;;  %v2057_v16 = vmov 0.0|0.0   ;;  %vm2058_vm0 = vmmov 0   ;;  %v2059_v17 = vmov 0.0  }
  0x5b   : > { %2032 = vsyncadd (%p2893_p2), [#allocation7], 4294963712  ;;  %v337_v3 = vmax.f32 %v2277_v0, %v2279_v1  ;;  %v321_v4 = vadd.f32 %v2279_v1, %v2277_v0  ;;  %v2287_v5 = vld [vmem:[%s278_s16 + $0x18] sm:$0xff]  ;;  %v2293_v8 = vld [vmem:[%s278_s16 + $0x30] sm:$0xff]  ;;  %1815 = vmatprep.subr.bf16.mxu0 %v2057_v16  ;;  %1804 = vmatprep.mubr.msk.f32.mxu0 %vm2058_vm0, %v2059_v17  ;;  %v2060_v19 = vmov 0   ;;  %vm349_vm1 = vcmask 7168  }
  0x5c   : > { %v340_v6 = vmax.f32 %v2281_v2, %v2287_v5  ;;  %v324_v7 = vadd.f32 %v2287_v5, %v2281_v2  ;;  %v2295_v9 = vld [vmem:[%s278_s16 + $0x38] sm:$0xff]  ;;  %v2297_v10 = vld [vmem:[%s278_s16 + $0x20] sm:$0xff]  ;;  %v2299_v11 = vld [vmem:[%s278_s16 + $0x28] sm:$0xff]  ;;  %1897 = vset.pattern.permute.xlu0 %v2060_v19  ;;  %1898 = vset.pattern.permute.xlu1 %v2060_v19  ;;  %vm361_vm2 = vcmask 261120   ;;  %vm464_vm3 = vcmask 15360   ;;  %s2061_s13 = smov 127  }
  0x5d   : > { %338 = vmax.xlane.f32.xlu1 %v337_v3  ;;  %322 = vadd.xlane.f32.xlu0 %v321_v4  ;;  %v330_v12 = vadd.f32 %v2295_v9, %v2293_v8  ;;  %v327_v13 = vadd.f32 %v2299_v11, %v2297_v10  ;;  %v346_v14 = vmax.f32 %v2293_v8, %v2295_v9  ;;  %v355_v18 = vld [vmem:[%s2840_s2] sm:$0x3]  ;;  %v441_v41 = vld [vmem:[%s2842_s4 + $0x8] sm:$0xff]  ;;  %v442_v42 = vld [vmem:[%s2842_s4 + $0x10] sm:$0xff]  ;;  %vm477_vm4 = vcmask 1041408   ;;  %s2062_s20 = smov 2  }
  0x5e   : > { %v343_v15 = vmax.f32 %v2297_v10, %v2299_v11  ;;  %v354_v38 = vld [vmem:[%s2839_s1] sm:$0x3]  ;;  %v443_v43 = vld [vmem:[%s2842_s4 + $0x18] sm:$0xff]  ;;  %v437_v49 = vld [vmem:[%s2841_s3 + $0x8] sm:$0xff]  ;;  %vm676_vm5 = vcmask 1040384   ;;  %s2063_s21 = smov 1  }
  0x5f   : > { %v436_v39 = vld [vmem:[%s2841_s3] sm:$0xff]  ;;  %v438_v50 = vld [vmem:[%s2841_s3 + $0x10] sm:$0xff]  ;;  %v439_v51 = vld [vmem:[%s2841_s3 + $0x18] sm:$0xff]  ;;  %s2064_s23 = smov 3   ;;  %s2065_s12 = smov 126  }
  0x60   : > { %1809 = vmatprep.mubr.msk.f32.mxu1 %vm464_vm3, %v436_v39  ;;  %v440_v40 = vld [vmem:[%s2842_s4] sm:$0xff]  ;;  %s2066_s16 = smov 125   ;;  %s2067_s8 = smov 48  }
  0x61   : > { %341 = vmax.xlane.f32.xlu1 %v340_v6  ;;  %325 = vadd.xlane.f32.xlu0 %v324_v7  ;;  %s2068_s10 = smov 32   ;;  %s2069_s25 = smov 16  }
  0x62   : > { %s2070_s30 = smov 112   ;;  %s2071_s24 = smov 96  }
  0x63   : > { %s2072_s15 = smov 80   ;;  %s1625_s11 = sld [smem:[#allocation2]] }
  0x65   : > { %331 = vadd.xlane.f32.xlu1 %v330_v12  ;;  %328 = vadd.xlane.f32.xlu0 %v327_v13 }
  0x69   : > { %347 = vmax.xlane.f32.xlu1 %v346_v14  ;;  %344 = vmax.xlane.f32.xlu0 %v343_v15 }
  0x7a   : > { %446 = vperm.xlu1 %1898, %v440_v40  }
  0x7e   : > { %451 = vperm.xlu1 %1898, %v441_v41  }
  0x7f   : > { %358 = vperm.xlu0 %1897, %v355_v18  }
  0x82   : > { %456 = vperm.xlu1 %1898, %v442_v42  }
  0x86   : > { %461 = vperm.xlu1 %1898, %v443_v43  }
  0xea   : > { %v339_v20 = vpop.xlane.xlu1 %338  ;;  %v323_v21 = vpop.xlane.xlu0 %322 }
  0xeb   : > { %v333_v22 = vmul.f32 0.00390625, %v323_v21 }
  0xed   : > { %v350_v26 = vsel %vm349_vm1, %v333_v22, %v339_v20 }
  0xee   : > { %v342_v23 = vpop.xlane.xlu1 %341  ;;  %v326_v24 = vpop.xlane.xlu0 %325 }
  0xef   : > { %v334_v25 = vmul.f32 0.00390625, %v326_v24 }
  0xf1   : > { %v351_v27 = vsel %vm349_vm1, %v334_v25, %v342_v23 }
  0xf2   : > { %v332_v28 = vpop.xlane.xlu1 %331  ;;  %v329_v29 = vpop.xlane.xlu0 %328  ;;  %v1816_v30 = vpack.c.bf16 %v351_v27, %v350_v26 }
  0xf3   : > { %v336_v31 = vmul.f32 0.00390625, %v332_v28  ;;  %v335_v32 = vmul.f32 0.00390625, %v329_v29 }
  0xf4   : > { %1817 = vmatpush3.bf16.msra.mxu0 %v1816_v30 }
  0xf5   : > { %1818 = vmatprep.subr.bf16.mxu0 %v2057_v16 }
  0xf6   : > { %v348_v33 = vpop.xlane.xlu1 %347  ;;  %v345_v34 = vpop.xlane.xlu0 %344 }
  0xf7   : > { %v353_v35 = vsel %vm349_vm1, %v336_v31, %v348_v33  ;;  %v352_v36 = vsel %vm349_vm1, %v335_v32, %v345_v34 }
  0xf8   : > { %v1819_v37 = vpack.c.bf16 %v353_v35, %v352_v36 }
  0xfa   : > { %1820 = vmatpush3.bf16.msra.mxu0 %v1819_v37  ;;  %v447_v52 = vpop.permute.xlu1 %446 }
  0xfd   : > { %1805 = vmatmul.mubr.msk.f32.vlgmr.msra.gmra.mrb[0].mxu0 %vm361_vm2, %v354_v38 }
  0xfe   : > { %v359_v44 = vpop.permute.xlu0 %358  ;;  %v452_v53 = vpop.permute.xlu1 %451 }
 0x102   : > { %v457_v60 = vpop.permute.xlu1 %456 }
 0x106   : > { %v462_v62 = vpop.permute.xlu1 %461 }
 0x1d0   : > { %v431_v45 = vpop.f32.mrb[0].mxu0 }
 0x1d1   : > { %v432_v46 = vadd.f32 %v431_v45, %v359_v44  ;;  %v1806_v47 = vpop.f32.mrb[1].mxu0 }
 0x1d3   : > { %v435_v48 = vmax.f32 %v432_v46, 0.0 }
 0x1d5   : > { %1807 = vmatprep.subr.msk.mxu1 %vm477_vm4, %v435_v48 }
 0x1d6   : > { %1808 = vmatpush3.msk.msra.mxu1 %vm477_vm4, %v435_v48 }
 0x1d7   : > { %1810 = vmatmul.mubr.msk.f32.vlgmr.msra.gmra.mrb[0].mxu1 %vm464_vm3, %v437_v49 }
 0x1d8   : > { %1812 = vmatprep.mubr.msk.f32.mxu1 %vm464_vm3, %v438_v50 }
 0x1db   : > { %1813 = vmatmul.mubr.msk.f32.gmra.mrb[2].mxu1 %vm464_vm3, %v439_v51 }
 0x2aa   : > { %v1811_v54 = vpop.f32.mrb[0].mxu1 }
 0x2ab   : > { %v553_v55 = vadd.f32 %v1811_v54, %v452_v53  ;;  %v547_v56 = vpop.f32.mrb[1].mxu1 }
 0x2ac   : > { %v548_v58 = vadd.f32 %v547_v56, %v447_v52 }
 0x2ad   : > { %572 = vrot.lane.b32.xlu1 %v553_v55, %s2061_s13 }
 0x2ae   : > { %v1814_v57 = vpop.f32.mrb[2].mxu1 }
 0x2af   : > { %v557_v59 = vpop.f32.mrb[3].mxu1  ;;  %v563_v63 = vadd.f32 %v1814_v57, %v462_v62 }
 0x2b0   : > { %v558_v61 = vadd.f32 %v557_v59, %v457_v60 }
 0x2b1   : > { %570 = vrot.lane.b32.xlu1 %v548_v58, %s2061_s13 }
 0x2b5   : > { %574 = vrot.lane.b32.xlu1 %v558_v61, %s2061_s13 }
 0x2b9   : > { %576 = vrot.lane.b32.xlu1 %v563_v63, %s2061_s13 }
 0x31f   : > { %v573_v3 = vpop.permute.xlu1 %572 }
 0x320   : > { %v583_v4 = vadd.f32 %v573_v3, %v553_v55 }
 0x322   : > { %v587_v6 = vsub.f32 0.0, %v583_v4 }
 0x323   : > { %v571_v7 = vpop.permute.xlu1 %570 }
 0x324   : > { %v592_v12 = vmul.f32 1.442695, %v587_v6  ;;  %v582_v13 = vadd.f32 %v571_v7, %v548_v58 }
 0x326   : > { %1899 = vpow2.f32 %v592_v12  ;;  %v586_v14 = vsub.f32 0.0, %v582_v13 }
 0x327   : > { %v575_v15 = vpop.permute.xlu1 %574 }
 0x328   : > { %v590_v16 = vmul.f32 1.442695, %v586_v14  ;;  %v584_v17 = vadd.f32 %v575_v15, %v558_v61 }
 0x32a   : > { %1901 = vpow2.f32 %v590_v16  ;;  %v588_v18 = vsub.f32 0.0, %v584_v17 }
 0x32b   : > { %v577_v19 = vpop.permute.xlu1 %576 }
 0x32c   : > { %v594_v20 = vmul.f32 1.442695, %v588_v18  ;;  %v585_v21 = vadd.f32 %v577_v19, %v563_v63 }
 0x32e   : > { %1903 = vpow2.f32 %v594_v20  ;;  %v589_v22 = vsub.f32 0.0, %v585_v21 }
 0x330   : > { %v1900_v23 = vpop.eup %1899  ;;  %v596_v24 = vmul.f32 1.442695, %v589_v22 }
 0x331   : > { %v599_v25 = vadd.f32 1.0, %v1900_v23 }
 0x332   : > { %1905 = vpow2.f32 %v596_v24 }
 0x333   : > { %1907 = vrcp.f32 %v599_v25 }
 0x334   : > { %v1902_v26 = vpop.eup %1901 }
 0x335   : > { %v598_v27 = vadd.f32 1.0, %v1902_v26  ;;  %v2391_v26 = vld [vmem:[#allocation6] sm:$0xff] }
 0x337   : > { %1909 = vrcp.f32 %v598_v27  ;;  %v2393_v27 = vld [vmem:[#allocation6 + $0x8] sm:$0xff] }
 0x338   : > { %v1904_v28 = vpop.eup %1903 }
 0x339   : > { %v600_v29 = vadd.f32 1.0, %v1904_v28  ;;  %v2395_v28 = vld [vmem:[#allocation6 + $0x20] sm:$0xff] }
 0x33b   : > { %1911 = vrcp.f32 %v600_v29  ;;  %v2397_v29 = vld [vmem:[#allocation6 + $0x28] sm:$0xff] }
 0x33c   : > { %v1906_v30 = vpop.eup %1905 }
 0x33d   : > { %v1908_v31 = vpop.eup %1907  ;;  %v601_v32 = vadd.f32 1.0, %v1906_v30  ;;  %v2399_v30 = vld [vmem:[#allocation6 + $0x48] sm:$0xff] }
 0x33e   : > { %617 = vperm.xlu1 %1898, %v1908_v31   ;;  %v2401_v31 = vld [vmem:[#allocation6 + $0x40] sm:$0xff] }
 0x33f   : > { %1913 = vrcp.f32 %v601_v32  ;;  %v2403_v32 = vld [vmem:[#allocation6 + $0x88] sm:$0xff] }
 0x341   : > { %v1910_v33 = vpop.eup %1909 }
 0x342   : > { %612 = vperm.xlu0 %1897, %v1910_v33  }
 0x345   : > { %v1912_v34 = vpop.eup %1911 }
 0x346   : > { %622 = vperm.xlu0 %1897, %v1912_v34  }
 0x349   : > { %v1914_v35 = vpop.eup %1913 }
 0x34a   : > { %627 = vperm.xlu1 %1898, %v1914_v35  }
 0x3bd   : > { %v618_v37 = vpop.permute.xlu1 %617 }
 0x3be   : > { %v2354_v41 = vmul.f32 %v618_v37, %v2281_v2  ;;  %v2357_v42 = vmul.f32 %v618_v37, %v2287_v5 }
 0x3c0   : > { %2896 = vst [vmem:[#allocation14_spill] sm:$0xff] %v2354_v41  ;;  %2897 = vst [vmem:[#allocation15_spill] sm:$0xff] %v2357_v42 }
 0x3c1   : > { %v613_v36 = vpop.permute.xlu0 %612 }
 0x3c2   : > { %v2348_v38 = vmul.f32 %v613_v36, %v2277_v0  ;;  %v2351_v39 = vmul.f32 %v613_v36, %v2279_v1 }
 0x3c4   : > { %2894 = vst [vmem:[#allocation12_spill] sm:$0xff] %v2348_v38  ;;  %2895 = vst [vmem:[#allocation13_spill] sm:$0xff] %v2351_v39  ;;  %v656_v0 = vadd.f32 %v2354_v41, %v2348_v38  ;;  %v665_v1 = vadd.f32 %v2357_v42, %v2351_v39 }
 0x3c5   : > { %v623_v40 = vpop.permute.xlu0 %622 }
 0x3c6   : > { %v2360_v43 = vmul.f32 %v623_v40, %v2297_v10  ;;  %v2363_v44 = vmul.f32 %v623_v40, %v2299_v11  ;;  %v2849_v40 = vlaneseq }
 0x3c8   : > { %2898 = vst [vmem:[#allocation16_spill] sm:$0xff] %v2360_v43  ;;  %2899 = vst [vmem:[#allocation17_spill] sm:$0xff] %v2363_v44  ;;  %v657_v46 = vadd.f32 %v656_v0, %v2360_v43  ;;  %v666_v2 = vadd.f32 %v665_v1, %v2363_v44  ;;  %v638_v11 = vmax.f32 %v2348_v38, %v2360_v43 }
 0x3c9   : > { %v628_v45 = vpop.permute.xlu1 %627  ;;  %v647_v47 = vmax.f32 %v2351_v39, %v2363_v44 }
 0x3ca   : > { %v2372_v5 = vmul.f32 %v628_v45, %v2293_v8  ;;  %v2375_v10 = vmul.f32 %v628_v45, %v2295_v9 }
 0x3cc   : > { %2900 = vst [vmem:[#allocation18_spill] sm:$0xff] %v2372_v5  ;;  %2901 = vst [vmem:[#allocation19_spill] sm:$0xff] %v2375_v10  ;;  %v639_v48 = vmax.f32 %v2354_v41, %v2372_v5  ;;  %v648_v49 = vmax.f32 %v2357_v42, %v2375_v10  ;;  %v658_v50 = vadd.f32 %v657_v46, %v2372_v5  ;;  %v726_v5 = vld [vmem:[#allocation6 + $0x18] sm:$0x3f] }
 0x3cd   : > { %v667_v8 = vadd.f32 %v666_v2, %v2375_v10  ;;  %v2416_v2 = vld [vmem:[#allocation6 + $0x80] sm:$0xff] }
 0x3ce   : > { %v640_v51 = vmax.f32 %v638_v11, %v639_v48  ;;  %v649_v52 = vmax.f32 %v647_v47, %v648_v49  ;;  %v659_v9 = vrot.slane %v658_v50, 4  ;;  %v2418_v11 = vld [vmem:[#allocation6 + $0xa0] sm:$0xff]  ;;  %v2420_v47 = vld [vmem:[#allocation6 + $0xa8] sm:$0xff] }
 0x3cf   : > { %v668_v53 = vrot.slane %v667_v8, 4  ;;  %2902 = vst [vmem:[#allocation20_spill] sm:$0xff] %v2418_v11  ;;  %2903 = vst [vmem:[#allocation21_spill] sm:$0xff] %v2420_v47  ;;  %v2422_v48 = vld [vmem:[#allocation6 + $0xc8] sm:$0xff] }
 0x3d0   : > { %v641_v54 = vrot.slane %v640_v51, 4  ;;  %v650_v55 = vrot.slane %v649_v52, 4  ;;  %v660_v56 = vadd.f32 %v659_v9, %v658_v50  ;;  %2904 = vst [vmem:[#allocation22_spill] sm:$0xff] %v2422_v48 }
 0x3d1   : > { %v669_v57 = vadd.f32 %v668_v53, %v667_v8 }
 0x3d2   : > { %v642_v58 = vmax.f32 %v640_v51, %v641_v54  ;;  %v651_v59 = vmax.f32 %v649_v52, %v650_v55  ;;  %v661_v60 = vrot.slane %v660_v56, 2  ;;  %v2425_v51 = vand.u32 127, %v2849_v40 }
 0x3d3   : > { %v670_v61 = vrot.slane %v669_v57, 2 }
 0x3d4   : > { %v643_v62 = vrot.slane %v642_v58, 2  ;;  %v652_v63 = vrot.slane %v651_v59, 2  ;;  %v662_v3 = vadd.f32 %v661_v60, %v660_v56  ;;  %vm692_vm6 = vcmp.lt.s32.totalorder %v2425_v51, 2 }
 0x3d5   : > { %v671_v4 = vadd.f32 %v670_v61, %v669_v57  ;;  %vm699_vm7 = vcmp.lt.s32.totalorder %v2425_v51, 1  ;;  %vm685_vm8 = vcmp.lt.s32.totalorder %v2425_v51, 3  ;;  %vm713_vm9 = vcmp.lt.s32.totalorder %v2425_v51, 126 }
 0x3d6   : > { %v644_v6 = vmax.f32 %v642_v58, %v643_v62  ;;  %v653_v7 = vmax.f32 %v651_v59, %v652_v63  ;;  %v663_v12 = vrot.slane %v662_v3, 1  ;;  %v2437_v59 = vld [vmem:[#allocation6 + $0xc0] sm:$0xff]  ;;  %vm706_vm10 = vcmp.lt.s32.totalorder %v2425_v51, 127 }
 0x3d7   : > { %v672_v13 = vrot.slane %v671_v4, 1  ;;  %2905 = vst [vmem:[#allocation23_spill] sm:$0xff] %v2437_v59  ;;  %v2447_v63 = vld [vmem:[#allocation6 + $0x60] sm:$0xff]  ;;  %vm720_vm11 = vcmp.lt.s32.totalorder %v2425_v51, 125  ;;  %vm997_vm12 = vcmp.lt.s32.totalorder %v2425_v51, 32  ;;  %vm873_vm13 = vcmp.lt.s32.totalorder %v2425_v51, 48 }
 0x3d8   : > { %v645_v14 = vrot.slane %v644_v6, 1  ;;  %v654_v15 = vrot.slane %v653_v7, 1  ;;  %v664_v16 = vadd.f32 %v663_v12, %v662_v3  ;;  %2906 = vst [vmem:[#allocation24_spill] sm:$0xff] %v2447_v63  ;;  %vm1123_vm14 = vcmp.lt.s32.totalorder %v2425_v51, 16 }
 0x3d9   : > { %v673_v17 = vadd.f32 %v672_v13, %v671_v4  ;;  %v2456_v13 = vld [vmem:[#allocation6 + $0x68] sm:$0xff]  ;;  %vm1368_vm15 = vcmp.lt.s32.totalorder %v2425_v51, 112  ;;  %vm1494_vm0 = vcmp.lt.s32.totalorder %v2425_v51, 96  ;;  %vm1620_vm1 = vcmp.lt.s32.totalorder %v2425_v51, 80 }
 0x3da   : > { %v646_v18 = vmax.f32 %v644_v6, %v645_v14  ;;  %v655_v19 = vmax.f32 %v653_v7, %v654_v15  ;;  %v674_v20 = vmul.f32 0.03125, %v664_v16  ;;  %2907 = vst [vmem:[#allocation25_spill] sm:$0xff] %v2456_v13 }
 0x3db   : > { %v675_v21 = vmul.f32 0.03125, %v673_v17 }
 0x3dc   : > { %v677_v23 = vsel %vm676_vm5, %v646_v18, %v674_v20 }
 0x3dd   : > { %v678_v22 = vsel %vm676_vm5, %v655_v19, %v675_v21  ;;  %688 = vrot.lane.b32.xlu0 %v677_v23, %s2062_s20  ;;  %v787_v25 = vrot.slane %v677_v23, 2 }
 0x3de   : > { %690 = vrot.lane.b32.xlu1 %v678_v22, %s2062_s20  ;;  %v2389_v24 = vrot.slane %v678_v22, 2  ;;  %s312_s20 = scalar_lea.vmem [#allocation8], %s1770_s22 }
 0x3df   : > { %v791_v34 = vmul.f32 %v787_v25, %v2391_v26  ;;  %v927_v36 = vmul.f32 %v2395_v28, %v787_v25  ;;  %v1053_v0 = vmul.f32 %v2401_v31, %v787_v25  ;;  %v1298_v55 = vmul.f32 %v2416_v2, %v787_v25 }
 0x3e0   : > { %v792_v33 = vmul.f32 %v2389_v24, %v2393_v27  ;;  %v928_v35 = vmul.f32 %v2397_v29, %v2389_v24  ;;  %v1054_v37 = vmul.f32 %v2399_v30, %v2389_v24  ;;  %v1299_v1 = vmul.f32 %v2403_v32, %v2389_v24 }
 0x3e1   : > { %695 = vrot.lane.b32.xlu0 %v677_v23, %s2063_s21  ;;  %v795_v46 = vrot.slane %v791_v34, 1  ;;  %v931_v50 = vrot.slane %v927_v36, 1  ;;  %v1057_v52 = vrot.slane %v1053_v0, 1  ;;  %v1425_v56 = vmul.f32 %v2420_v47, %v2389_v24 }
 0x3e2   : > { %697 = vrot.lane.b32.xlu1 %v678_v22, %s2063_s21  ;;  %v796_v45 = vrot.slane %v792_v33, 1  ;;  %v932_v49 = vrot.slane %v928_v35, 1  ;;  %v1058_v8 = vrot.slane %v1054_v37, 1  ;;  %v1303_v9 = vrot.slane %v1299_v1, 1  ;;  %s1679_s21 = sshll.u32 %s312_s20, 4  ;;  %s2793_s21 = int_to_ptr.vmem [resolvable:$true] %s1679_s21 }
 0x3e3   : > { %v2429_v54 = vadd.f32 %v795_v46, %v791_v34  ;;  %v1424_v57 = vmul.f32 %v2418_v11, %v787_v25  ;;  %v1551_v58 = vmul.f32 %v2422_v48, %v2389_v24  ;;  %v2441_v61 = vadd.f32 %v931_v50, %v927_v36  ;;  %s1981_s22 = scalar_lea.vmem %s2793_s21, 1024 }
 0x3e4   : > { %v2427_v53 = vadd.f32 %v796_v45, %v792_v33  ;;  %v2439_v60 = vadd.f32 %v932_v49, %v928_v35  ;;  %v2443_v62 = vadd.f32 %v1058_v8, %v1054_v37  ;;  %v2449_v3 = vadd.f32 %v1057_v52, %v1053_v0  ;;  %p1982_p4 = scmp.ne.s32.totalorder %s2793_s21, %s1981_s22 }
 0x3e5   : > { %679 = vrot.lane.b32.xlu0 %v677_v23, %s2064_s23  ;;  %v2451_v4 = vadd.f32 %v1303_v9, %v1299_v1  ;;  %v1302_v12 = vrot.slane %v1298_v55, 1  ;;  %v1429_v14 = vrot.slane %v1425_v56, 1  ;;  %v1428_v15 = vrot.slane %v1424_v57, 1 }
 0x3e6   : > { %681 = vrot.lane.b32.xlu1 %v678_v22, %s2064_s23  ;;  %v1555_v16 = vrot.slane %v1551_v58, 1  ;;  %v1550_v17 = vmul.f32 %v2437_v59, %v787_v25  ;;  %p1983_p6 = pnand %p1982_p4, %p2212_p12 }
 0x3e7   : > { %v2475_v1 = vadd.f32 %v1302_v12, %v1298_v55  ;;  %v2481_v45 = vadd.f32 %v1429_v14, %v1425_v56  ;;  %v2483_v46 = vadd.f32 %v1428_v15, %v1424_v57 }
 0x3e8   : > { %v2485_v49 = vadd.f32 %v1555_v16, %v1551_v58  ;;  %v1554_v50 = vrot.slane %v1550_v17, 1  ;;  %p1984_p8 = pneg %p1983_p6 }
 0x3e9   : > { %709 = vrot.lane.b32.xlu0 %v677_v23, %s2065_s12  ;;  %2909 = vst [vmem:[#allocation27_spill] sm:$0xff] %v2475_v1  ;;  %2911 = vst [vmem:[#allocation29_spill] sm:$0xff] %v2481_v45 }
 0x3ea   : > { %711 = vrot.lane.b32.xlu1 %v678_v22, %s2065_s12  ;;  %2912 = vst [vmem:[#allocation30_spill] sm:$0xff] %v2483_v46  ;;  %2913 = vst [vmem:[#allocation31_spill] sm:$0xff] %v2485_v49 }
 0x3ed   : > { %702 = vrot.lane.b32.xlu0 %v677_v23, %s2061_s13 }
 0x3ee   : > { %704 = vrot.lane.b32.xlu1 %v678_v22, %s2061_s13  ;;  %s1785_s13 = sshll.u32 %s2139_s6, 10  ;;  %s1666_s6 = scalar_lea.sflag [#allocation5], %s2263_s17 }
 0x3f1   : > { %716 = vrot.lane.b32.xlu0 %v677_v23, %s2066_s16  ;;  %v2463_v23 = vmul.f32 %v2447_v63, %v787_v25  ;;  %v2479_v25 = vmul.f32 %v2456_v13, %v2389_v24 }
 0x3f2   : > { %718 = vrot.lane.b32.xlu1 %v678_v22, %s2066_s16  ;;  %s2787_s16 = scalar_lea.hbm %s2845_s7, %s1785_s13 }
 0x3f3   : > { %2908 = vst [vmem:[#allocation26_spill] sm:$0xff] %v2463_v23  ;;  %2910 = vst [vmem:[#allocation28_spill] sm:$0xff] %v2479_v25 }
 0x44f   : > { %v689_v19 = vpop.permute.xlu0 %688 }
 0x450   : > { %v691_v18 = vpop.permute.xlu1 %690 }
 0x451   : > { %v693_v33 = vsel %vm692_vm6, %v689_v19, %v691_v18  ;;  %v694_v34 = vsel %vm692_vm6, %v691_v18, %v689_v19 }
 0x452   : > { %v2471_v37 = vrot.slane %v694_v34, 6  ;;  %v2473_v0 = vrot.slane %v693_v33, 6 }
 0x453   : > { %v696_v52 = vpop.permute.xlu0 %695 }
 0x454   : > { %v698_v8 = vpop.permute.xlu1 %697  ;;  %v744_v9 = vmul.f32 %v2473_v0, %v2393_v27  ;;  %v743_v55 = vmul.f32 %v2471_v37, %v2391_v26  ;;  %v892_v12 = vmul.f32 %v2397_v29, %v2473_v0  ;;  %v2500_v58 = vmul.f32 %v2395_v28, %v2471_v37 }
 0x455   : > { %v700_v56 = vsel %vm699_vm7, %v696_v52, %v698_v8  ;;  %v701_v57 = vsel %vm699_vm7, %v698_v8, %v696_v52  ;;  %v2504_v14 = vmul.f32 %v2399_v30, %v2473_v0  ;;  %v2509_v16 = vmul.f32 %v2401_v31, %v2471_v37 }
 0x456   : > { %v748_v15 = vrot.slane %v744_v9, 1  ;;  %v2517_v52 = vadd.f32 %v1554_v50, %v1550_v17  ;;  %v2519_v40 = vrot.slane %v701_v57, 4  ;;  %v2521_v24 = vrot.slane %v700_v56, 4 }
 0x457   : > { %v680_v35 = vpop.permute.xlu0 %679  ;;  %v747_v22 = vrot.slane %v743_v55, 1  ;;  %v896_v18 = vrot.slane %v892_v12, 1 }
 0x458   : > { %2914 = vst [vmem:[#allocation32_spill] sm:$0xff] %v2517_v52  ;;  %v682_v36 = vpop.permute.xlu1 %681  ;;  %v752_v56 = vadd.f32 %v748_v15, %v744_v9  ;;  %v768_v7 = vmul.f32 %v2521_v24, %v2393_v27  ;;  %v767_v15 = vmul.f32 %v2519_v40, %v2391_v26  ;;  %v2559_v42 = vmul.f32 %v2397_v29, %v2521_v24 }
 0x459   : > { %v686_v19 = vsel %vm685_vm8, %v680_v35, %v682_v36  ;;  %v687_v33 = vsel %vm685_vm8, %v682_v36, %v680_v35  ;;  %v751_v9 = vadd.f32 %v747_v22, %v743_v55  ;;  %v2549_v57 = vadd.f32 %v896_v18, %v892_v12 }
 0x45a   : > { %v727_v17 = vmul.f32 %v2391_v26, %v687_v33  ;;  %v728_v50 = vmul.f32 %v2393_v27, %v686_v19  ;;  %v2534_v21 = vmul.f32 %v2395_v28, %v687_v33  ;;  %v2537_v20 = vmul.f32 %v2397_v29, %v686_v19 }
 0x45b   : > { %v2540_v35 = vmul.f32 %v2401_v31, %v687_v33  ;;  %v2543_v36 = vmul.f32 %v2399_v30, %v686_v19  ;;  %v710_v34 = vpop.permute.xlu0 %709  ;;  %v2552_v10 = vmul.f32 %v2447_v63, %v687_v33  ;;  %v2555_v44 = vmul.f32 %v2456_v13, %v686_v19 }
 0x45c   : > { %v712_v8 = vpop.permute.xlu1 %711  ;;  %v731_v6 = vrot.slane %v727_v17, 1  ;;  %v732_v39 = vrot.slane %v728_v50, 1  ;;  %v2562_v27 = vmul.f32 %v2416_v2, %v687_v33  ;;  %v2565_v22 = vmul.f32 %v2403_v32, %v686_v19 }
 0x45d   : > { %2915 = vst [vmem:[#allocation33_spill] sm:$0xff] %v2552_v10  ;;  %2916 = vst [vmem:[#allocation34_spill] sm:$0xff] %v2555_v44  ;;  %v2568_v26 = vmul.f32 %v2418_v11, %v687_v33  ;;  %v886_v12 = vrot.slane %v2537_v20, 1  ;;  %v2576_v43 = vmul.f32 %v2420_v47, %v686_v19  ;;  %v2579_v41 = vmul.f32 %v2437_v59, %v687_v33 }
 0x45e   : > { %v2582_v38 = vmul.f32 %v2422_v48, %v686_v19  ;;  %v714_v18 = vsel %vm713_vm9, %v710_v34, %v712_v8  ;;  %v715_v29 = vsel %vm713_vm9, %v712_v8, %v710_v34  ;;  %v736_v13 = vadd.f32 %v732_v39, %v728_v50  ;;  %v725_v39 = vld [vmem:[#allocation6 + $0x10] sm:$0x3f] }
 0x45f   : > { %2917 = vst [vmem:[#allocation35_spill] sm:$0xff] %v2568_v26  ;;  %2918 = vst [vmem:[#allocation36_spill] sm:$0xff] %v2579_v41  ;;  %v703_v23 = vpop.permute.xlu0 %702  ;;  %v2590_v63 = vrot.slane %v714_v18, 6  ;;  %v2592_v33 = vrot.slane %v715_v29, 6  ;;  %v756_v44 = vrot.slane %v752_v56, 2  ;;  %v772_v49 = vrot.slane %v768_v7, 1 }
 0x460   : > { %v705_v25 = vpop.permute.xlu1 %704  ;;  %v735_v18 = vadd.f32 %v731_v6, %v727_v17  ;;  %v755_v29 = vrot.slane %v751_v9, 2  ;;  %v771_v59 = vrot.slane %v767_v15, 1 }
 0x461   : > { %v2596_v19 = vsel %vm706_vm10, %v703_v23, %v705_v25  ;;  %v2600_v55 = vsel %vm706_vm10, %v705_v25, %v703_v23  ;;  %v828_v8 = vmul.f32 %v2592_v33, %v726_v5  ;;  %v760_v23 = vadd.f32 %v756_v44, %v736_v13 }
 0x462   : > { %v810_v10 = vmul.f32 %v726_v5, %v2600_v55  ;;  %v776_v25 = vadd.f32 %v772_v49, %v768_v7  ;;  %v759_v11 = vadd.f32 %v755_v29, %v735_v18  ;;  %v775_v6 = vadd.f32 %v771_v59, %v767_v15 }
 0x463   : > { %v717_v34 = vpop.permute.xlu0 %716  ;;  %v832_v45 = vrot.slane %v828_v8, 1  ;;  %v809_v17 = vmul.f32 %v725_v39, %v2596_v19  ;;  %v2919_v59 = vrot.slane %v2427_v53, 6  ;;  %v914_v29 = vrot.slane %v2559_v42, 1 }
 0x464   : > { %v719_v52 = vpop.permute.xlu1 %718  ;;  %v814_v48 = vrot.slane %v810_v10, 1  ;;  %v780_v26 = vrot.slane %v776_v25, 4  ;;  %v779_v7 = vrot.slane %v775_v6, 4  ;;  %v890_v25 = vadd.f32 %v886_v12, %v2537_v20 }
 0x465   : > { %v721_v46 = vsel %vm720_vm11, %v717_v34, %v719_v52  ;;  %v722_v41 = vsel %vm720_vm11, %v719_v52, %v717_v34  ;;  %v836_v1 = vadd.f32 %v832_v45, %v828_v8  ;;  %v827_v52 = vmul.f32 %v2590_v63, %v725_v39  ;;  %v880_v8 = vld [vmem:[#allocation6 + $0x38] sm:$0x3f] }
 0x466   : > { %v2608_v50 = vrot.slane %v721_v46, 4  ;;  %v2610_v56 = vrot.slane %v722_v41, 4  ;;  %v818_v9 = vadd.f32 %v814_v48, %v810_v10  ;;  %v784_v44 = vadd.f32 %v780_v26, %v760_v23 }
 0x467   : > { %v813_v13 = vrot.slane %v809_v17, 1  ;;  %v840_v41 = vrot.slane %v836_v1, 2  ;;  %v831_v34 = vrot.slane %v827_v52, 1  ;;  %v783_v18 = vadd.f32 %v779_v7, %v759_v11 }
 0x468   : > { %v852_v47 = vmul.f32 %v2610_v56, %v726_v5  ;;  %v851_v46 = vmul.f32 %v2608_v50, %v725_v39  ;;  %v808_v15 = vadd.f32 %v2919_v59, %v784_v44  ;;  %v904_v26 = vrot.slane %v2549_v57, 2 }
 0x469   : > { %v817_v10 = vadd.f32 %v813_v13, %v809_v17  ;;  %v835_v5 = vadd.f32 %v831_v34, %v827_v52  ;;  %v2920_v1 = vrot.slane %v2429_v54, 6  ;;  %v946_v20 = vmul.f32 %v880_v8, %v2600_v55 }
 0x46a   : > { %v856_v49 = vrot.slane %v852_v47, 1  ;;  %v855_v48 = vrot.slane %v851_v46, 1  ;;  %v820_v23 = vadd.f32 %v818_v9, %v808_v15  ;;  %v908_v44 = vadd.f32 %v904_v26, %v890_v25 }
 0x46b   : > { %v807_v39 = vadd.f32 %v2920_v1, %v783_v18  ;;  %v839_v53 = vrot.slane %v835_v5, 2  ;;  %v918_v11 = vadd.f32 %v914_v29, %v2559_v42  ;;  %v950_v7 = vrot.slane %v946_v20, 1 }
 0x46c   : > { %v860_v45 = vadd.f32 %v856_v49, %v852_v47  ;;  %v859_v6 = vadd.f32 %v855_v48, %v851_v46  ;;  %v844_v17 = vadd.f32 %v840_v41, %v820_v23  ;;  %v958_v57 = vmul.f32 %v880_v8, %v2592_v33  ;;  %v879_v49 = vld [vmem:[#allocation6 + $0x30] sm:$0x3f] }
 0x46d   : > { %v819_v47 = vadd.f32 %v817_v10, %v807_v39  ;;  %v922_v13 = vrot.slane %v918_v11, 4  ;;  %v976_v9 = vmul.f32 %v880_v8, %v2610_v56  ;;  %v2921_v54 = vrot.slane %v2534_v21, 1 }
 0x46e   : > { %v864_v12 = vrot.slane %v860_v45, 4  ;;  %v863_v52 = vrot.slane %v859_v6, 4  ;;  %v954_v15 = vadd.f32 %v950_v7, %v946_v20  ;;  %v2922_v42 = vrot.slane %v2500_v58, 1 }
 0x46f   : > { %v889_v46 = vadd.f32 %v2921_v54, %v2534_v21  ;;  %v843_v59 = vadd.f32 %v839_v53, %v819_v47  ;;  %v926_v25 = vadd.f32 %v922_v13, %v908_v44  ;;  %v962_v18 = vrot.slane %v958_v57, 1 }
 0x470   : > { %v868_v34 = vadd.f32 %v864_v12, %v844_v17  ;;  %v899_v41 = vadd.f32 %v2922_v42, %v2500_v58  ;;  %v980_v10 = vrot.slane %v976_v9, 1  ;;  %v909_v48 = vmul.f32 %v2395_v28, %v2519_v40  ;;  %v1006_v17 = vld [vmem:[#allocation6 + $0x58] sm:$0x3f] }
 0x471   : > { %v867_v45 = vadd.f32 %v863_v52, %v843_v59  ;;  %v945_v8 = vmul.f32 %v879_v49, %v2596_v19  ;;  %v957_v21 = vmul.f32 %v879_v49, %v2590_v63  ;;  %v2923_v26 = vrot.slane %v2439_v60, 6 }
 0x472   : > { %871 = vrot.lane.b32.xlu1 %v868_v34, %s2067_s8  ;;  %v903_v5 = vrot.slane %v899_v41, 2  ;;  %v966_v23 = vadd.f32 %v962_v18, %v958_v57  ;;  %v984_v1 = vadd.f32 %v980_v10, %v976_v9  ;;  %v913_v58 = vrot.slane %v909_v48, 1 }
 0x473   : > { %v944_v29 = vadd.f32 %v2923_v26, %v926_v25  ;;  %869 = vrot.lane.b32.xlu0 %v867_v45, %s2067_s8  ;;  %v949_v6 = vrot.slane %v945_v8, 1  ;;  %v961_v20 = vrot.slane %v957_v21, 1  ;;  %v975_v28 = vmul.f32 %v879_v49, %v2608_v50  ;;  %s2073_s8 = smov [#allocation8]  }
 0x474   : > { %v907_v39 = vadd.f32 %v903_v5, %v889_v46  ;;  %v970_v53 = vrot.slane %v966_v23, 2  ;;  %v988_v44 = vrot.slane %v984_v1, 4  ;;  %v917_v11 = vadd.f32 %v913_v58, %v909_v48 }
 0x475   : > { %v956_v12 = vadd.f32 %v954_v15, %v944_v29  ;;  %v1383_v47 = vrot.slane %v2576_v43, 1  ;;  %v965_v52 = vadd.f32 %v961_v20, %v957_v21  ;;  %v979_v7 = vrot.slane %v975_v28, 1  ;;  %v1005_v29 = vld [vmem:[#allocation6 + $0x50] sm:$0x3f] }
 0x476   : > { %v2924_v60 = vrot.slane %v2543_v36, 1  ;;  %v921_v9 = vrot.slane %v917_v11, 4  ;;  %v2925_v54 = vrot.slane %v2504_v14, 1  ;;  %v1036_v49 = vmul.f32 %v2399_v30, %v2521_v24 }
 0x477   : > { %v974_v57 = vadd.f32 %v970_v53, %v956_v12  ;;  %v953_v34 = vadd.f32 %v949_v6, %v945_v8  ;;  %v983_v59 = vadd.f32 %v979_v7, %v975_v28  ;;  %v1072_v15 = vmul.f32 %v1006_v17, %v2600_v55 }
 0x478   : > { %v1016_v13 = vadd.f32 %v2924_v60, %v2543_v36  ;;  %v1026_v46 = vadd.f32 %v2925_v54, %v2504_v14  ;;  %v1084_v42 = vmul.f32 %v1006_v17, %v2592_v33  ;;  %v925_v25 = vadd.f32 %v921_v9, %v907_v39 }
 0x479   : > { %v992_v41 = vadd.f32 %v988_v44, %v974_v57  ;;  %v1040_v10 = vrot.slane %v1036_v49, 1  ;;  %v969_v36 = vrot.slane %v965_v52, 2  ;;  %v1076_v48 = vrot.slane %v1072_v15, 1 }
 0x47a   : > { %v1030_v18 = vrot.slane %v1026_v46, 2  ;;  %v1088_v45 = vrot.slane %v1084_v42, 1  ;;  %v1102_v5 = vmul.f32 %v1006_v17, %v2610_v56  ;;  %v2926_v30 = vrot.slane %v2441_v61, 6 }
 0x47b   : > { %995 = vrot.lane.b32.xlu1 %v992_v41, %s2068_s10  ;;  %v987_v8 = vrot.slane %v983_v59, 4  ;;  %v1044_v26 = vadd.f32 %v1040_v10, %v1036_v49  ;;  %v2927_v58 = vrot.slane %v2540_v35, 1  ;;  %v2928_v6 = vrot.slane %v2509_v16, 1 }
 0x47c   : > { %v943_v14 = vadd.f32 %v2926_v30, %v925_v25  ;;  %v1034_v21 = vadd.f32 %v1030_v18, %v1016_v13  ;;  %v1092_v23 = vadd.f32 %v1088_v45, %v1084_v42  ;;  %v1106_v1 = vrot.slane %v1102_v5, 1  ;;  %v1251_v42 = vld [vmem:[#allocation6 + $0x98] sm:$0x3f] }
 0x47d   : > { %v1015_v39 = vadd.f32 %v2927_v58, %v2540_v35  ;;  %v1025_v20 = vadd.f32 %v2928_v6, %v2509_v16  ;;  %v1048_v12 = vrot.slane %v1044_v26, 4  ;;  %v1035_v61 = vmul.f32 %v2401_v31, %v2519_v40 }
 0x47e   : > { %v955_v28 = vadd.f32 %v953_v34, %v943_v14  ;;  %v1071_v53 = vmul.f32 %v1005_v29, %v2596_v19  ;;  %v1509_v44 = vrot.slane %v2582_v38, 1  ;;  %v1080_v11 = vadd.f32 %v1076_v48, %v1072_v15 }
 0x47f   : > { %v1110_v17 = vadd.f32 %v1106_v1, %v1102_v5  ;;  %v1083_v52 = vmul.f32 %v1005_v29, %v2590_v63  ;;  %v1052_v60 = vadd.f32 %v1048_v12, %v1034_v21  ;;  %v1029_v35 = vrot.slane %v1025_v20, 2 }
 0x480   : > { %v973_v7 = vadd.f32 %v969_v36, %v955_v28  ;;  %v1039_v13 = vrot.slane %v1035_v61, 1  ;;  %v1096_v57 = vrot.slane %v1092_v23, 2  ;;  %v1075_v9 = vrot.slane %v1071_v53, 1 }
 0x481   : > { %v1087_v16 = vrot.slane %v1083_v52, 1  ;;  %v1101_v54 = vmul.f32 %v1005_v29, %v2608_v50  ;;  %v2929_v31 = vrot.slane %v2443_v62, 6  ;;  %v1033_v34 = vadd.f32 %v1029_v35, %v1015_v39 }
 0x482   : > { %v991_v46 = vadd.f32 %v987_v8, %v973_v7  ;;  %v1043_v59 = vadd.f32 %v1039_v13, %v1035_v61  ;;  %v1114_v15 = vrot.slane %v1110_v17, 4  ;;  %v1263_v18 = vmul.f32 %v2403_v32, %v2473_v0  ;;  %v1250_v7 = vld [vmem:[#allocation6 + $0x90] sm:$0x3f] }
 0x483   : > { %v1070_v49 = vadd.f32 %v2929_v31, %v1052_v60  ;;  %v1091_v41 = vadd.f32 %v1087_v16, %v1083_v52  ;;  %v1105_v25 = vrot.slane %v1101_v54, 1  ;;  %v1281_v48 = vmul.f32 %v2403_v32, %v2521_v24 }
 0x484   : > { %993 = vrot.lane.b32.xlu0 %v991_v46, %s2068_s10  ;;  %v1047_v36 = vrot.slane %v1043_v59, 4  ;;  %v1317_v45 = vmul.f32 %v1251_v42, %v2600_v55  ;;  %v1079_v62 = vadd.f32 %v1075_v9, %v1071_v53  ;;  %v1267_v30 = vrot.slane %v1263_v18, 1  ;;  %s1985_s10 = sshll.u32 %s2073_s8, 4  ;;  %s1986_s10 = int_to_ptr.vmem [resolvable:$false] %s1985_s10 }
 0x485   : > { %v1082_v10 = vadd.f32 %v1080_v11, %v1070_v49  ;;  %v1109_v5 = vadd.f32 %v1105_v25, %v1101_v54  ;;  %v1329_v14 = vmul.f32 %v1251_v42, %v2592_v33  ;;  %v1285_v26 = vrot.slane %v1281_v48, 1  ;;  %p1988_p10 = scmp.lt.s32.totalorder %s2793_s21, %s1986_s10 }
 0x486   : > { %v1051_v21 = vadd.f32 %v1047_v36, %v1033_v34  ;;  %v1321_v29 = vrot.slane %v1317_v45, 1  ;;  %v2930_v23 = vrot.slane %v2565_v22, 1  ;;  %v1271_v58 = vadd.f32 %v1267_v30, %v1263_v18  ;;  %v1377_v30 = vld [vmem:[#allocation6 + $0xb8] sm:$0x3f] }
 0x487   : > { %v1100_v8 = vadd.f32 %v1096_v57, %v1082_v10  ;;  %v1333_v39 = vrot.slane %v1329_v14, 1  ;;  %v1347_v6 = vmul.f32 %v1251_v42, %v2610_v56  ;;  %v2931_v20 = vrot.slane %v2449_v3, 6 }
 0x488   : > { %v1261_v1 = vadd.f32 %v2930_v23, %v2565_v22  ;;  %v1095_v12 = vrot.slane %v1091_v41, 2  ;;  %v1289_v61 = vadd.f32 %v1285_v26, %v1281_v48  ;;  %v1113_v53 = vrot.slane %v1109_v5, 4 }
 0x489   : > { %v1118_v32 = vadd.f32 %v1114_v15, %v1100_v8  ;;  %v1069_v28 = vadd.f32 %v2931_v20, %v1051_v21  ;;  %v1275_v11 = vrot.slane %v1271_v58, 2  ;;  %v1325_v17 = vadd.f32 %v1321_v29, %v1317_v45 }
 0x48a   : > { %v1351_v52 = vrot.slane %v1347_v6, 1  ;;  %v1337_v22 = vadd.f32 %v1333_v39, %v1329_v14  ;;  %v1262_v35 = vmul.f32 %v2416_v2, %v2471_v37  ;;  %v1280_v13 = vmul.f32 %v2416_v2, %v2519_v40 }
 0x48b   : > { %1121 = vrot.lane.b32.xlu1 %v1118_v32, %s2069_s25  ;;  %v1081_v60 = vadd.f32 %v1079_v62, %v1069_v28  ;;  %v1279_v3 = vadd.f32 %v1275_v11, %v1261_v1  ;;  %v1293_v57 = vrot.slane %v1289_v61, 4  ;;  %v1316_v16 = vmul.f32 %v1250_v7, %v2596_v19 }
 0x48c   : > { %v1355_v9 = vadd.f32 %v1351_v52, %v1347_v6  ;;  %v1266_v46 = vrot.slane %v1262_v35, 1  ;;  %v1284_v31 = vrot.slane %v1280_v13, 1  ;;  %v1328_v49 = vmul.f32 %v1250_v7, %v2590_v63 }
 0x48d   : > { %v1099_v54 = vadd.f32 %v1095_v12, %v1081_v60  ;;  %v1297_v34 = vadd.f32 %v1293_v57, %v1279_v3  ;;  %v2932_v59 = vrot.slane %v2562_v27, 1  ;;  %v1320_v15 = vrot.slane %v1316_v16, 1 }
 0x48e   : > { %v1346_v41 = vmul.f32 %v1250_v7, %v2608_v50  ;;  %v1270_v2 = vadd.f32 %v1266_v46, %v1262_v35  ;;  %v1288_v18 = vadd.f32 %v1284_v31, %v1280_v13  ;;  %v1332_v10 = vrot.slane %v1328_v49, 1  ;;  %v2935_v13 = vld [vmem:[#allocation27_spill] sm:$0xff]  ;;  %v1376_v46 = vld [vmem:[#allocation6 + $0xb0] sm:$0x3f] }
 0x48f   : > { %v1260_v42 = vadd.f32 %v2932_v59, %v2562_v27  ;;  %v1117_v25 = vadd.f32 %v1113_v53, %v1099_v54  ;;  %v2933_v36 = vrot.slane %v2451_v4, 6  ;;  %v1341_v45 = vrot.slane %v1337_v22, 2  ;;  %v2934_v27 = vld [vmem:[#allocation21_spill] sm:$0xff] }
 0x490   : > { %v1359_v62 = vrot.slane %v1355_v9, 4  ;;  %v1350_v5 = vrot.slane %v1346_v41, 1  ;;  %v1274_v14 = vrot.slane %v1270_v2, 2  ;;  %v1324_v8 = vadd.f32 %v1320_v15, %v1316_v16 }
 0x491   : > { %v1315_v48 = vadd.f32 %v2933_v36, %v1297_v34  ;;  %1119 = vrot.lane.b32.xlu0 %v1117_v25, %s2069_s25  ;;  %v1336_v21 = vadd.f32 %v1332_v10, %v1328_v49  ;;  %v1389_v26 = vmul.f32 %v2934_v27, %v2473_v0  ;;  %v1407_v1 = vmul.f32 %v2934_v27, %v2521_v24 }
 0x492   : > { %v1354_v23 = vadd.f32 %v1350_v5, %v1346_v41  ;;  %v1443_v4 = vmul.f32 %v1377_v30, %v2600_v55  ;;  %v1278_v58 = vadd.f32 %v1274_v14, %v1260_v42  ;;  %v1292_v39 = vrot.slane %v1288_v18, 4 }
 0x493   : > { %v1327_v29 = vadd.f32 %v1325_v17, %v1315_v48  ;;  %v1393_v6 = vrot.slane %v1389_v26, 1  ;;  %v1455_v32 = vmul.f32 %v1377_v30, %v2592_v33  ;;  %v1387_v28 = vadd.f32 %v1383_v47, %v2576_v43  ;;  %v2937_v47 = vld [vmem:[#allocation20_spill] sm:$0xff] }
 0x494   : > { %v1411_v12 = vrot.slane %v1407_v1, 1  ;;  %v1447_v61 = vrot.slane %v1443_v4, 1  ;;  %v1296_v53 = vadd.f32 %v1292_v39, %v1278_v58  ;;  %v1473_v52 = vmul.f32 %v1377_v30, %v2610_v56  ;;  %v1503_v39 = vld [vmem:[#allocation6 + $0xd8] sm:$0x3f] }
 0x495   : > { %v1345_v20 = vadd.f32 %v1341_v45, %v1327_v29  ;;  %v1397_v11 = vadd.f32 %v1393_v6, %v1389_v26  ;;  %v1459_v17 = vrot.slane %v1455_v32, 1  ;;  %v1340_v60 = vrot.slane %v1336_v21, 2  ;;  %v2938_v45 = vld [vmem:[#allocation35_spill] sm:$0xff]  ;;  %v2940_v29 = vld [vmem:[#allocation29_spill] sm:$0xff] }
 0x496   : > { %v1358_v22 = vrot.slane %v1354_v23, 4  ;;  %v1415_v35 = vadd.f32 %v1411_v12, %v1407_v1  ;;  %v2936_v3 = vrot.slane %v2935_v13, 6  ;;  %v1451_v16 = vadd.f32 %v1447_v61, %v1443_v4 }
 0x497   : > { %v1363_v7 = vadd.f32 %v1359_v62, %v1345_v20  ;;  %v1401_v9 = vrot.slane %v1397_v11, 2  ;;  %v1477_v54 = vrot.slane %v1473_v52, 1  ;;  %v1463_v43 = vadd.f32 %v1459_v17, %v1455_v32 }
 0x498   : > { %v1314_v57 = vadd.f32 %v2936_v3, %v1296_v53  ;;  %v1388_v31 = vmul.f32 %v2937_v47, %v2471_v37  ;;  %v1406_v49 = vmul.f32 %v2937_v47, %v2519_v40  ;;  %v1442_v34 = vmul.f32 %v1376_v46, %v2596_v19 }
 0x499   : > { %1366 = vrot.lane.b32.xlu1 %v1363_v7, %s2070_s30  ;;  %v1405_v42 = vadd.f32 %v1401_v9, %v1387_v28  ;;  %v1419_v15 = vrot.slane %v1415_v35, 4  ;;  %v1481_v41 = vadd.f32 %v1477_v54, %v1473_v52  ;;  %v1454_v10 = vmul.f32 %v1376_v46, %v2590_v63  ;;  %v2942_v28 = vld [vmem:[#allocation22_spill] sm:$0xff] }
 0x49a   : > { %v1326_v59 = vadd.f32 %v1324_v8, %v1314_v57  ;;  %v1392_v25 = vrot.slane %v1388_v31, 1  ;;  %v1410_v2 = vrot.slane %v1406_v49, 1  ;;  %v1446_v18 = vrot.slane %v1442_v34, 1 }
 0x49b   : > { %v1423_v48 = vadd.f32 %v1419_v15, %v1405_v42  ;;  %v2939_v62 = vrot.slane %v2938_v45, 1  ;;  %v1472_v30 = vmul.f32 %v1376_v46, %v2608_v50  ;;  %v1467_v14 = vrot.slane %v1463_v43, 2  ;;  %v2943_v43 = vld [vmem:[#allocation36_spill] sm:$0xff] }
 0x49c   : > { %v1344_v36 = vadd.f32 %v1340_v60, %v1326_v59  ;;  %v1396_v21 = vadd.f32 %v1392_v25, %v1388_v31  ;;  %v1414_v27 = vadd.f32 %v1410_v2, %v1406_v49  ;;  %v1458_v8 = vrot.slane %v1454_v10, 1  ;;  %v2944_v59 = vld [vmem:[#allocation30_spill] sm:$0xff] }
 0x49d   : > { %v1386_v5 = vadd.f32 %v2939_v62, %v2938_v45  ;;  %v2941_v23 = vrot.slane %v2940_v29, 6  ;;  %v1485_v4 = vrot.slane %v1481_v41, 4  ;;  %v1476_v58 = vrot.slane %v1472_v30, 1 }
 0x49e   : > { %v1362_v26 = vadd.f32 %v1358_v22, %v1344_v36  ;;  %v1400_v6 = vrot.slane %v1396_v21, 2  ;;  %v1418_v32 = vrot.slane %v1414_v27, 4  ;;  %v1450_v20 = vadd.f32 %v1446_v18, %v1442_v34  ;;  %v1502_v18 = vld [vmem:[#allocation6 + $0xd0] sm:$0x3f] }
 0x49f   : > { %v1441_v1 = vadd.f32 %v2941_v23, %v1423_v48  ;;  %v1515_v12 = vmul.f32 %v2942_v28, %v2473_v0  ;;  %v1462_v53 = vadd.f32 %v1458_v8, %v1454_v10  ;;  %v1533_v11 = vmul.f32 %v2942_v28, %v2521_v24 }
 0x4a0   : > { %1364 = vrot.lane.b32.xlu0 %v1362_v26, %s2070_s30  ;;  %v1569_v17 = vmul.f32 %v1503_v39, %v2600_v55  ;;  %v1404_v52 = vadd.f32 %v1400_v6, %v1386_v5  ;;  %v1480_v7 = vadd.f32 %v1476_v58, %v1472_v30  ;;  %v1581_v22 = vmul.f32 %v1503_v39, %v2592_v33  ;;  %v2947_v6 = vld [vmem:[#allocation32_spill] sm:$0xff]  ;;  %s1987_s30 = scalar_lea.vmem %s1986_s10, 2048 }
 0x4a1   : > { %v1453_v61 = vadd.f32 %v1451_v16, %v1441_v1  ;;  %v1519_v60 = vrot.slane %v1515_v12, 1  ;;  %v1513_v13 = vadd.f32 %v1509_v44, %v2582_v38  ;;  %v1537_v3 = vrot.slane %v1533_v11, 1  ;;  %v2946_v44 = vld [vmem:[#allocation23_spill] sm:$0xff]  ;;  %p1989_p13 = scmp.lt.s32.totalorder %s1987_s30, %s1981_s22 }
 0x4a2   : > { %v1573_v57 = vrot.slane %v1569_v17, 1  ;;  %v1422_v9 = vadd.f32 %v1418_v32, %v1404_v52  ;;  %v1585_v54 = vrot.slane %v1581_v22, 1  ;;  %v1599_v46 = vmul.f32 %v1503_v39, %v2610_v56  ;;  %v2951_v52 = vld [vmem:[#allocation34_spill] sm:$0xff] }
 0x4a3   : > { %v1471_v35 = vadd.f32 %v1467_v14, %v1453_v61  ;;  %v1523_v16 = vadd.f32 %v1519_v60, %v1515_v12  ;;  %v1508_v47 = vrot.slane %v2943_v43, 1  ;;  %v1466_v49 = vrot.slane %v1462_v53, 2  ;;  %v2949_v61 = vld [vmem:[#allocation31_spill] sm:$0xff]  ;;  %p1990_p3 = por %p1989_p13, %p1988_p10 }
 0x4a4   : > { %v1541_v34 = vadd.f32 %v1537_v3, %v1533_v11  ;;  %v2945_v42 = vrot.slane %v2944_v59, 6  ;;  %v1484_v41 = vrot.slane %v1480_v7, 4  ;;  %v1603_v2 = vrot.slane %v1599_v46, 1 }
 0x4a5   : > { %v1489_v31 = vadd.f32 %v1485_v4, %v1471_v35  ;;  %v1527_v25 = vrot.slane %v1523_v16, 2  ;;  %v1577_v38 = vadd.f32 %v1573_v57, %v1569_v17  ;;  %v1514_v10 = vmul.f32 %v2946_v44, %v2471_v37  ;;  %p1991_p7 = pnand %p1990_p3, %p1984_p8 }
 0x4a6   : > { %v1440_v15 = vadd.f32 %v2945_v42, %v1422_v9  ;;  %v1532_v36 = vmul.f32 %v2946_v44, %v2519_v40  ;;  %v1568_v48 = vmul.f32 %v1502_v18, %v2596_v19  ;;  %v1545_v5 = vrot.slane %v1541_v34, 4  ;;  %v2952_v9 = vld [vmem:[#allocation24_spill] sm:$0xff] }
 0x4a7   : > { %1492 = vrot.lane.b32.xlu1 %v1489_v31, %s2071_s24  ;;  %v1531_v62 = vadd.f32 %v1527_v25, %v1513_v13  ;;  %v1589_v30 = vadd.f32 %v1585_v54, %v1581_v22  ;;  %v1607_v14 = vadd.f32 %v1603_v2, %v1599_v46  ;;  %v1518_v21 = vrot.slane %v1514_v10, 1 }
 0x4a8   : > { %v1452_v45 = vadd.f32 %v1450_v20, %v1440_v15  ;;  %v1536_v27 = vrot.slane %v1532_v36, 1  ;;  %v1580_v8 = vmul.f32 %v1502_v18, %v2590_v63  ;;  %v1572_v23 = vrot.slane %v1568_v48, 1  ;;  %v2948_v20 = vld [vmem:[#allocation33_spill] sm:$0xff] }
 0x4a9   : > { %v1549_v29 = vadd.f32 %v1545_v5, %v1531_v62  ;;  %v1598_v1 = vmul.f32 %v1502_v18, %v2608_v50  ;;  %v1512_v4 = vadd.f32 %v1508_v47, %v2943_v43  ;;  %v1522_v58 = vadd.f32 %v1518_v21, %v1514_v10  ;;  %v2953_v43 = vld [vmem:[#allocation25_spill] sm:$0xff]  ;;  %v2954_v62 = vld [vmem:[#allocation26_spill] sm:$0xff] }
 0x4aa   : > { %v1470_v26 = vadd.f32 %v1466_v49, %v1452_v45  ;;  %v1540_v39 = vadd.f32 %v1536_v27, %v1532_v36  ;;  %v1562_v32 = vrot.slane %v2947_v6, 6  ;;  %v1137_v28 = vrot.slane %v2948_v20, 1 }
 0x4ab   : > { %v2950_v53 = vrot.slane %v2949_v61, 6  ;;  %v1584_v17 = vrot.slane %v1580_v8, 1  ;;  %v1138_v7 = vrot.slane %v2951_v52, 1  ;;  %v1593_v60 = vrot.slane %v1589_v30, 2  ;;  %v2956_v30 = vld [vmem:[#allocation28_spill] sm:$0xff] }
 0x4ac   : > { %v1488_v12 = vadd.f32 %v1484_v41, %v1470_v26  ;;  %v1526_v22 = vrot.slane %v1522_v58, 2  ;;  %v1602_v35 = vrot.slane %v1598_v1, 1  ;;  %v1611_v3 = vrot.slane %v1607_v14, 4 }
 0x4ad   : > { %v1567_v11 = vadd.f32 %v2950_v53, %v1549_v29  ;;  %v1576_v57 = vadd.f32 %v1572_v23, %v1568_v48  ;;  %v1143_v16 = vmul.f32 %v2952_v9, %v2471_v37  ;;  %v1544_v46 = vrot.slane %v1540_v39, 4 }
 0x4ae   : > { %1490 = vrot.lane.b32.xlu0 %v1488_v12, %s2071_s24  ;;  %v1530_v54 = vadd.f32 %v1526_v22, %v1512_v4  ;;  %v1144_v47 = vmul.f32 %v2953_v43, %v2473_v0  ;;  %v1161_v31 = vmul.f32 %v2952_v9, %v2519_v40  ;;  %v1588_v34 = vadd.f32 %v1584_v17, %v1580_v8 }
 0x4af   : > { %v1579_v13 = vadd.f32 %v1577_v38, %v1567_v11  ;;  %v1147_v59 = vrot.slane %v1143_v16, 1  ;;  %v1162_v42 = vmul.f32 %v2953_v43, %v2521_v24  ;;  %v1606_v41 = vadd.f32 %v1602_v35, %v1598_v1 }
 0x4b0   : > { %v1548_v15 = vadd.f32 %v1544_v46, %v1530_v54  ;;  %v1148_v25 = vrot.slane %v1144_v47, 1  ;;  %v1165_v2 = vrot.slane %v1161_v31, 1  ;;  %v1141_v37 = vadd.f32 %v1137_v28, %v2948_v20 }
 0x4b1   : > { %v1597_v49 = vadd.f32 %v1593_v60, %v1579_v13  ;;  %v1151_v38 = vadd.f32 %v1147_v59, %v1143_v16  ;;  %v1166_v44 = vrot.slane %v1162_v42, 1  ;;  %v1142_v0 = vadd.f32 %v1138_v7, %v2951_v52  ;;  %v1131_v52 = vld [vmem:[#allocation6 + $0x70] sm:$0x3f]  ;;  %v1132_v7 = vld [vmem:[#allocation6 + $0x78] sm:$0x3f] }
 0x4b2   : > { %v1566_v10 = vadd.f32 %v1562_v32, %v1548_v15  ;;  %v1152_v36 = vadd.f32 %v1148_v25, %v1144_v47  ;;  %v1169_v40 = vadd.f32 %v1165_v2, %v1161_v31  ;;  %v2955_v24 = vrot.slane %v2954_v62, 1 }
 0x4b3   : > { %v1615_v18 = vadd.f32 %v1611_v3, %v1597_v49  ;;  %v1155_v48 = vrot.slane %v1151_v38, 2  ;;  %v1170_v45 = vadd.f32 %v1166_v44, %v1162_v42  ;;  %v2957_v14 = vrot.slane %v2956_v30, 1 }
 0x4b4   : > { %v1187_v5 = vadd.f32 %v2955_v24, %v2954_v62  ;;  %v1578_v27 = vadd.f32 %v1576_v57, %v1566_v10  ;;  %v1592_v8 = vrot.slane %v1588_v34, 2  ;;  %v1610_v26 = vrot.slane %v1606_v41, 4 }
 0x4b5   : > { %1618 = vrot.lane.b32.xlu1 %v1615_v18, %s2072_s15  ;;  %v1188_v21 = vadd.f32 %v2957_v14, %v2956_v30  ;;  %v1156_v29 = vrot.slane %v1152_v36, 2  ;;  %v1159_v23 = vadd.f32 %v1155_v48, %v1141_v37  ;;  %v1173_v1 = vrot.slane %v1169_v40, 4 }
 0x4b6   : > { %v1596_v4 = vadd.f32 %v1592_v8, %v1578_v27  ;;  %v1174_v39 = vrot.slane %v1170_v45, 4  ;;  %v1191_v32 = vrot.slane %v1187_v5, 6  ;;  %v1197_v22 = vmul.f32 %v1131_v52, %v2596_v19 }
 0x4b7   : > { %v1160_v58 = vadd.f32 %v1156_v29, %v1142_v0  ;;  %v1177_v6 = vadd.f32 %v1173_v1, %v1159_v23  ;;  %v1192_v12 = vrot.slane %v1188_v21, 6  ;;  %v1198_v35 = vmul.f32 %v1132_v7, %v2600_v55 }
 0x4b8   : > { %v1614_v20 = vadd.f32 %v1610_v26, %v1596_v4  ;;  %v1209_v13 = vmul.f32 %v1131_v52, %v2590_v63  ;;  %v1210_v3 = vmul.f32 %v1132_v7, %v2592_v33  ;;  %v1227_v9 = vmul.f32 %v1131_v52, %v2608_v50 }
 0x4b9   : > { %v1178_v28 = vadd.f32 %v1174_v39, %v1160_v58  ;;  %v1195_v61 = vadd.f32 %v1191_v32, %v1177_v6  ;;  %v1228_v16 = vmul.f32 %v1132_v7, %v2610_v56  ;;  %v1201_v54 = vrot.slane %v1197_v22, 1 }
 0x4ba   : > { %1616 = vrot.lane.b32.xlu0 %v1614_v20, %s2072_s15  ;;  %v1202_v46 = vrot.slane %v1198_v35, 1  ;;  %v1213_v43 = vrot.slane %v1209_v13, 1  ;;  %v1214_v47 = vrot.slane %v1210_v3, 1  ;;  %v1231_v49 = vrot.slane %v1227_v9, 1 }
 0x4bb   : > { %v1196_v53 = vadd.f32 %v1192_v12, %v1178_v28  ;;  %v1232_v34 = vrot.slane %v1228_v16, 1  ;;  %v1205_v55 = vadd.f32 %v1201_v54, %v1197_v22 }
 0x4bc   : > { %v1206_v59 = vadd.f32 %v1202_v46, %v1198_v35  ;;  %v1217_v63 = vadd.f32 %v1213_v43, %v1209_v13  ;;  %v1218_v42 = vadd.f32 %v1214_v47, %v1210_v3  ;;  %v1235_v33 = vadd.f32 %v1231_v49, %v1227_v9 }
 0x4bd   : > { %v1236_v50 = vadd.f32 %v1232_v34, %v1228_v16  ;;  %v1207_v25 = vadd.f32 %v1205_v55, %v1195_v61  ;;  %v2958_v46 = vlaneseq  ;;  %v2959_v55 = vld [vmem:[#allocation12_spill] sm:$0xff] }
 0x4be   : > { %v1208_v2 = vadd.f32 %v1206_v59, %v1196_v53  ;;  %v1221_v37 = vrot.slane %v1217_v63, 2  ;;  %v1222_v18 = vrot.slane %v1218_v42, 2  ;;  %v1239_v48 = vrot.slane %v1235_v33, 4  ;;  %v2960_v63 = vld [vmem:[#allocation14_spill] sm:$0xff]  ;;  %v2961_v33 = vld [vmem:[#allocation16_spill] sm:$0xff] }
 0x4bf   : > { %v1240_v45 = vrot.slane %v1236_v50, 4  ;;  %v1626_v53 = vstv %s1625_s11  ;;  %v1642_v43 = vshrl.u32 %v2958_v46, 7 }
 0x4c0   : > { %v1225_v30 = vadd.f32 %v1221_v37, %v1207_v25  ;;  %v1226_v14 = vadd.f32 %v1222_v18, %v1208_v2  ;;  %v2964_v2 = vld [vmem:[#allocation15_spill] sm:$0xff]  ;;  %v2965_v18 = vld [vmem:[#allocation17_spill] sm:$0xff] }
 0x4c1   : > { %v1643_v47 = vsub.s32 0, %v1642_v43 }
 0x4c2   : > { %v1243_v21 = vadd.f32 %v1239_v48, %v1225_v30  ;;  %v1244_v27 = vadd.f32 %v1240_v45, %v1226_v14 }
 0x4e4   : > { %v872_v11 = vpop.permute.xlu1 %871 }
 0x4e5   : > { %v870_v17 = vpop.permute.xlu0 %869 }
 0x4e6   : > { %v874_v38 = vsel %vm873_vm13, %v870_v17, %v872_v11  ;;  %v875_v44 = vsel %vm873_vm13, %v872_v11, %v870_v17 }
 0x4ed   : > { %v996_v60 = vpop.permute.xlu1 %995 }
 0x4f6   : > { %v994_v57 = vpop.permute.xlu0 %993 }
 0x4f7   : > { %v998_v56 = vsel %vm997_vm12, %v994_v57, %v996_v60  ;;  %v999_v15 = vsel %vm997_vm12, %v996_v60, %v994_v57 }
 0x4f8   : > { %v1000_v36 = vadd.f32 %v999_v15, %v875_v44  ;;  %v1001_v40 = vadd.f32 %v998_v56, %v874_v38  ;;  %v2962_v56 = vld [vmem:[#allocation18_spill] sm:$0xff]  ;;  %v2966_v44 = vld [vmem:[#allocation19_spill] sm:$0xff] }
 0x4fd   : > { %v1122_v31 = vpop.permute.xlu1 %1121 }
 0x503   : > { %v1120_v19 = vpop.permute.xlu0 %1119 }
 0x504   : > { %v1124_v0 = vsel %vm1123_vm14, %v1120_v19, %v1122_v31  ;;  %v1125_v10 = vsel %vm1123_vm14, %v1122_v31, %v1120_v19 }
 0x505   : > { %v1126_v24 = vadd.f32 %v1125_v10, %v1000_v36  ;;  %v1127_v5 = vadd.f32 %v1124_v0, %v1001_v40 }
 0x507   : > { %v1245_v26 = vadd.f32 %v1243_v21, %v1126_v24  ;;  %v1246_v29 = vadd.f32 %v1244_v27, %v1127_v5 }
 0x50b   : > { %v1367_v41 = vpop.permute.xlu1 %1366 }
 0x512   : > { %v1365_v62 = vpop.permute.xlu0 %1364 }
 0x513   : > { %v1369_v1 = vsel %vm1368_vm15, %v1365_v62, %v1367_v41  ;;  %v1370_v4 = vsel %vm1368_vm15, %v1367_v41, %v1365_v62  ;;  %v2963_v41 = vld [vmem:[#allocation13_spill] sm:$0xff] }
 0x514   : > { %v1371_v6 = vadd.f32 %v1369_v1, %v1245_v26  ;;  %v1372_v32 = vadd.f32 %v1370_v4, %v1246_v29 }
 0x519   : > { %v1493_v8 = vpop.permute.xlu1 %1492 }
 0x520   : > { %v1491_v23 = vpop.permute.xlu0 %1490 }
 0x521   : > { %v1495_v58 = vsel %vm1494_vm0, %v1491_v23, %v1493_v8  ;;  %v1496_v39 = vsel %vm1494_vm0, %v1493_v8, %v1491_v23 }
 0x522   : > { %v1497_v28 = vadd.f32 %v1495_v58, %v1371_v6  ;;  %v1498_v12 = vadd.f32 %v1496_v39, %v1372_v32 }
 0x527   : > { %v1619_v20 = vpop.permute.xlu1 %1618 }
 0x52c   : > { %v1617_v61 = vpop.permute.xlu0 %1616 }
 0x52d   : > { %v1621_v11 = vsel %vm1620_vm1, %v1617_v61, %v1619_v20  ;;  %v1622_v17 = vsel %vm1620_vm1, %v1619_v20, %v1617_v61 }
 0x52e   : > { %v1623_v52 = vadd.f32 %v1621_v11, %v1497_v28  ;;  %v1624_v7 = vadd.f32 %v1622_v17, %v1498_v12 }
 0x530   : > { %v1627_v60 = vadd.f32 %v1626_v53, %v1623_v52  ;;  %v1628_v22 = vadd.f32 %v1626_v53, %v1624_v7 }
 0x532   : > { %v1629_v35 = vsub.f32 0.0, %v1627_v60  ;;  %v1630_v13 = vsub.f32 0.0, %v1628_v22 }
 0x534   : > { %v1631_v3 = vmul.f32 1.442695, %v1629_v35  ;;  %v1633_v57 = vmul.f32 1.442695, %v1630_v13 }
 0x536   : > { %1915 = vpow2.f32 %v1631_v3 }
 0x537   : > { %1917 = vpow2.f32 %v1633_v57 }
 0x540   : > { %v1916_v9 = vpop.eup %1915 }
 0x541   : > { %v1918_v51 = vpop.eup %1917  ;;  %v1635_v16 = vadd.f32 1.0, %v1916_v9 }
 0x542   : > { %v1636_v54 = vadd.f32 1.0, %v1918_v51 }
 0x543   : > { %1919 = vrcp.f32 %v1635_v16 }
 0x544   : > { %1921 = vrcp.f32 %v1636_v54 }
 0x54d   : > { %v1920_v31 = vpop.eup %1919 }
 0x54e   : > { %v1922_v49 = vpop.eup %1921  ;;  %v1644_v34 = vrot.slane %v1920_v31, %v1643_v47 }
 0x54f   : > { %v1648_v19 = vrot.slane %v1922_v49, %v1643_v47 }
 0x550   : > { %v1649_v59 = vmul.f32 %v1644_v34, %v2959_v55  ;;  %v1651_v42 = vmul.f32 %v1644_v34, %v2960_v63  ;;  %v1653_v50 = vmul.f32 %v1644_v34, %v2961_v33  ;;  %v1655_v15 = vmul.f32 %v1644_v34, %v2962_v56 }
 0x551   : > { %v1650_v25 = vmul.f32 %v1648_v19, %v2963_v41  ;;  %v1652_v37 = vmul.f32 %v1648_v19, %v2964_v2  ;;  %v1654_v38 = vmul.f32 %v1648_v19, %v2965_v18  ;;  %v1656_v0 = vmul.f32 %v1648_v19, %v2966_v44 }
 0x552   : > { %1657 = vst [vmem:[%s312_s20] sm:$0xff] %v1649_v59  ;;  %1659 = vst [vmem:[%s312_s20 + $0x10] sm:$0xff] %v1651_v42 }
 0x553   : > { %1661 = vst [vmem:[%s312_s20 + $0x20] sm:$0xff] %v1653_v50  ;;  %1663 = vst [vmem:[%s312_s20 + $0x30] sm:$0xff] %v1655_v15 }
 0x554   : > { %1658 = vst [vmem:[%s312_s20 + $0x8] sm:$0xff] %v1650_v25  ;;  %1660 = vst [vmem:[%s312_s20 + $0x18] sm:$0xff] %v1652_v37 }
 0x555   : > { %1662 = vst [vmem:[%s312_s20 + $0x28] sm:$0xff] %v1654_v38  ;;  %1664 = vst [vmem:[%s312_s20 + $0x38] sm:$0xff] %v1656_v0 }
 0x556   : > { %1994 = shalt.err (!%p1991_p7)
}
 0x557   : > { %s1995_s24 = scalar_lea.hbm %s2787_s16, 1024  ;;  %s1999_s13 = scalar_lea.hbm %s2845_s7, 2048 }
 0x558   : > { %p1996_p9 = scmp.ne.s32.totalorder %s2787_s16, %s1995_s24  ;;  %p2000_p5 = scmp.lt.u32.totalorder %s2787_s16, %s2845_s7 }
 0x559   : > { %p2001_p11 = scmp.lt.u32.totalorder %s1999_s13, %s1995_s24  ;;  %p2003_p4 = scmp.lt.u32.totalorder %s1995_s24, %s2787_s16 }
 0x55a   : > { %p1997_p1 = pnand %p1996_p9, %p2212_p12 }
 0x55b   : > { %p2002_p2 = por %p2001_p11, %p2000_p5 }
 0x55c   : > { %p1998_p0 = pneg %p1997_p1 }
 0x55d   : > { %p2004_p6 = por %p2003_p4, %p2002_p2 }
 0x55f   : > { %p2005_p8 = pnand %p2004_p6, %p1998_p0 }
 0x561   : > { %2008 = shalt.err (!%p2005_p8)
}
 0x562   : > { %s2074_s12 = smov 256  }
 0x563   : > { %1827 = dma.vmem_to_hbm [thread:$0]  (%p2212_p12), %s2793_s21, 1024, %s2787_s16, %s1666_s6, %s2074_s12, %s2074_s12, %s2069_s25  }
 0x564 PF: > { %s1694_s22 = sand.u32 1, %s2039_s26   ;;  %p2967_p10 = scmp.ne.s32.totalorder %s2884_s9, 0 }
 0x565   : > { %p2968_p13 = scmp.ge.s32.totalorder %s2051_s29, 2  ;;  %s1695_s8 = scalar_lea.sflag [#allocation5], %s1694_s22 }
 0x567   : > { %p1838_p3 = pnand %p2968_p13, %p2967_p10 }
 0x569   : > { %2034 = dma.done.wait (!%p1838_p3), %s1695_s8, 1024  }
 0x56a   : > { %2036 = vsyncadd (!%p1838_p3), %s1695_s8, 4294966272  ;;  %p22_p7 = scmp.ge.s32.totalorder %s2174_s14, 4   ;;  %s2969_s26 = smov %s2043_s27 }
 0x56b   : > { %s2970_s27 = smov %s2047_s28  ;;  %s2971_s28 = smov %s2208_s18 }
 0x56c   : > { %s2972_s29 = smov %s2174_s14  ;;  %24 = sbr.rel (!%p22_p7) target bundleno = 8 (0x8), region = 103 }
 0x573   :  { %1700 = vsyncpa [#allocation4], 1 }
 0x574   :  { %1702 = vsyncpa [#allocation4 + $0x1], 1 }
 0x575   :  { %1703 = vsyncpa [#allocation7], 1 }
 0x576   :  { %1704 = vsyncpa [#allocation5], 1 }
 0x577   :  { %1706 = vsyncpa [#allocation5 + $0x1], 1 }

</bundles_post_ra>
